<compile_context>
chip_gen: v7x
topology: tpu7x:2x2x1
jax: 0.10.0
libtpu: 0.0.40
codegen_flags: <defaults>
</compile_context>

<pallas_src>
import numpy as np

import jax
import jax.numpy as jnp
from jax import lax
from jax.experimental import pallas as pl
from jax.experimental.pallas import tpu as pltpu

BN_EPS = 1e-5


# ----------------------------------------------------------------- kernel ---
def _segresnet_kernel(
    x_ref,                                   # (1, 16, 16*4)  merged NHWC input
    s2a_ref, s2b_ref, s1_ref,                # row-select matrices (s=2,2,1)
    sh4_ref, sh8_ref,                        # row shift-up: y[m] = x[m+1]
    p8_ref, p16_ref,                         # row interleave (even/odd)
    w0_ref, b0_ref,                          # encoder conv0 (4 -> 8,  s=2)
    w1_ref, b1_ref,                          # encoder conv1 (8 -> 16, s=2)
    rs1_ref, rt1_ref, wra_ref, bra_ref,      # ResBlock: BN1 affine, conv a
    rs2_ref, rt2_ref, wrb_ref, brb_ref,      # ResBlock: BN2 affine, conv b
    u1a_ref, u1b_ref, bu1_ref,               # decoder convT1 (cat 16+16 -> 8)
    u0a_ref, u0b_ref, bu0_ref,               # decoder convT0 (cat 8+8  -> 3)
    out_ref,                                 # (1, 16, 16*3)
):
    f32 = jnp.float32

    def mm(a, b):
        return jnp.dot(a, b, preferred_element_type=f32)

    x = x_ref[0].astype(f32)                              # (16, 64)

    # ---- encoder block 0: Conv3x3 s=2 (BN folded) + ReLU -> (8, 8*8)
    acc = jnp.zeros((s2a_ref.shape[1], w0_ref.shape[2]), f32)
    for dy in range(3):                                   # row taps, unrolled
        acc = acc + mm(mm(s2a_ref[dy], x), w0_ref[dy])
    e1 = jnp.maximum(acc + b0_ref[...], 0.0)

    # ---- encoder block 1: Conv3x3 s=2 (BN folded) + ReLU -> (4, 4*16)
    acc = jnp.zeros((s2b_ref.shape[1], w1_ref.shape[2]), f32)
    for dy in range(3):
        acc = acc + mm(mm(s2b_ref[dy], e1), w1_ref[dy])
    e2 = jnp.maximum(acc + b1_ref[...], 0.0)

    # ---- intermediate ResBlock: BN-ReLU-Conv-BN-ReLU-Conv + identity
    a = jnp.maximum(e2 * rs1_ref[...] + rt1_ref[...], 0.0)
    acc = jnp.zeros_like(e2)
    for dy in range(3):
        acc = acc + mm(mm(s1_ref[dy], a), wra_ref[dy])
    a = acc + bra_ref[...]
    a = jnp.maximum(a * rs2_ref[...] + rt2_ref[...], 0.0)
    acc = jnp.zeros_like(e2)
    for dy in range(3):
        acc = acc + mm(mm(s1_ref[dy], a), wrb_ref[dy])
    xi = acc + brb_ref[...] + e2                          # (4, 4*16)

    # ---- decoder level 1: cat(xi, e2) -> ConvT3x3 s=2 (BN folded) + ReLU
    # Phase decomposition: even/odd output rows, then interleave.
    # 'cat' skip realized as two dots against split weight halves.
    xi_s = mm(sh4_ref[...], xi)                           # rows m+1 (zero last)
    e2_s = mm(sh4_ref[...], e2)
    y_ev = mm(xi, u1a_ref[1]) + mm(e2, u1b_ref[1])
    y_od = (mm(xi, u1a_ref[0]) + mm(e2, u1b_ref[0])
            + mm(xi_s, u1a_ref[2]) + mm(e2_s, u1b_ref[2]))
    d1 = mm(p8_ref[0], y_ev) + mm(p8_ref[1], y_od) + bu1_ref[...]
    d1 = jnp.maximum(d1, 0.0)                             # (8, 8*8)

    # ---- decoder level 0: cat(d1, e1) -> ConvT3x3 s=2 (BN folded) + ReLU
    d1_s = mm(sh8_ref[...], d1)
    e1_s = mm(sh8_ref[...], e1)
    y_ev = mm(d1, u0a_ref[1]) + mm(e1, u0b_ref[1])
    y_od = (mm(d1, u0a_ref[0]) + mm(e1, u0b_ref[0])
            + mm(d1_s, u0a_ref[2]) + mm(e1_s, u0b_ref[2]))
    out = mm(p16_ref[0], y_ev) + mm(p16_ref[1], y_od) + bu0_ref[...]
    out = jnp.maximum(out, 0.0)                           # (16, 16*3)

    out_ref[0] = out.astype(out_ref.dtype)


# ------------------------------------------------- host-side weight folding --
def _fold_bn(w, b, bn):
    """Fold eval-mode BatchNorm that FOLLOWS a conv into its weights/bias."""
    gamma, beta, mean, var = bn
    s = gamma * lax.rsqrt(var + BN_EPS)
    return w * s, (b - mean) * s + beta


def _conv_cols(w, w_in, w_out, stride, pad):
    """Fold the 3 column taps (+ column padding / stride) of a 3x3 conv into
    block-banded matrices.  w: (3,3,Cin,Cout) HWIO.
    Returns (3, w_in*Cin, w_out*Cout); row tap dy pairs with input row
    stride*i + dy - pad (handled by the row-selection matrices)."""
    _, kw, cin, cout = w.shape
    bw = jnp.zeros((3, w_in * cin, w_out * cout), jnp.float32)
    for wo in range(w_out):
        for kx in range(kw):
            wi = stride * wo + kx - pad
            if 0 <= wi < w_in:
                bw = bw.at[:, wi * cin:(wi + 1) * cin,
                           wo * cout:(wo + 1) * cout].add(w[:, kx])
    return bw


def _convT_cols(w, w_in):
    """ConvTranspose(k=3, s=2, p=1, output_padding=1), column part.
    w: (3,3,Cin,Cout) in the dilate(2)+pad(1,2)+valid-3x3-conv parameterization
    (identical to the previous implementation).  Returns cw of shape
    (3, w_in*Cin, 2*w_in*Cout) such that
       even output rows 2m   : x[m]   @ cw[1]
       odd  output rows 2m+1 : x[m]   @ cw[0] + x[m+1] @ cw[2]."""
    _, _, cin, cout = w.shape
    cw = jnp.zeros((3, w_in * cin, 2 * w_in * cout), jnp.float32)
    for n in range(w_in):
        cw = cw.at[:, n * cin:(n + 1) * cin,
                   (2 * n) * cout:(2 * n + 1) * cout].add(w[:, 1])
        cw = cw.at[:, n * cin:(n + 1) * cin,
                   (2 * n + 1) * cout:(2 * n + 2) * cout].add(w[:, 0])
        if n >= 1:
            cw = cw.at[:, n * cin:(n + 1) * cin,
                       (2 * n - 1) * cout:(2 * n) * cout].add(w[:, 2])
    return cw


def _tile_cols(v, w_cols):
    """Per-channel vector -> merged (1, w_cols*C) row."""
    return jnp.tile(v.astype(jnp.float32), w_cols).reshape(1, -1)


def _bn_affine(bn, w_cols):
    gamma, beta, mean, var = bn
    s = gamma * lax.rsqrt(var + BN_EPS)
    t = beta - mean * s
    return _tile_cols(s, w_cols), _tile_cols(t, w_cols)


def _row_select(h_out, h_in, stride, pad):
    """S[dy, i, j] = 1 iff j == stride*i + dy - pad (zero-padding on rows)."""
    s = np.zeros((3, h_out, h_in), np.float32)
    for dy in range(3):
        for i in range(h_out):
            j = stride * i + dy - pad
            if 0 <= j < h_in:
                s[dy, i, j] = 1.0
    return jnp.asarray(s)


def _shift_up(h):
    return jnp.asarray(np.eye(h, k=1, dtype=np.float32))


def _interleave(h):
    p = np.zeros((2, 2 * h, h), np.float32)
    for m in range(h):
        p[0, 2 * m, m] = 1.0
        p[1, 2 * m + 1, m] = 1.0
    return jnp.asarray(p)


def _const_spec(arr):
    nd = arr.ndim
    return pl.BlockSpec(arr.shape, lambda b, _nd=nd: (0,) * _nd)


# --------------------------------------------------------------- forward ----
def segresnet_forward(params, x_nchw):
    n, cin, hh, ww = x_nchw.shape            # (N, 4, 16, 16)
    c0, c1 = 8, 16                           # channels = (8, 16)
    cout = 3
    h1, h2 = hh // 2, hh // 4                # 8, 4

    # layout plumbing only: NCHW -> NHWC -> merged (N, H, W*C)
    x_m = jnp.transpose(x_nchw, (0, 2, 3, 1)).reshape(n, hh, ww * cin)
    x_m = x_m.astype(jnp.float32)

    # encoder convs (BN folded; column taps / stride-2 folded into weights)
    pd0, pd1 = params["down"]
    w0, b0 = _fold_bn(pd0["w"], pd0["b"], pd0["bn"])
    w1, b1 = _fold_bn(pd1["w"], pd1["b"], pd1["bn"])
    W0, B0 = _conv_cols(w0, ww, h1, 2, 1), _tile_cols(b0, h1)
    W1, B1 = _conv_cols(w1, h1, h2, 2, 1), _tile_cols(b1, h2)

    # intermediate ResBlock
    pi = params["inter"]
    RS1, RT1 = _bn_affine(pi["n1"], h2)
    RS2, RT2 = _bn_affine(pi["n2"], h2)
    WRA, BRA = _conv_cols(pi["w1"], h2, h2, 1, 1), _tile_cols(pi["b1"], h2)
    WRB, BRB = _conv_cols(pi["w2"], h2, h2, 1, 1), _tile_cols(pi["b2"], h2)

    # decoder transposed convs; the 'cat' skip becomes split weight halves
    pu1 = params["up"][1]                    # used first:  cat(16+16) -> 8
    wu1, bu1 = _fold_bn(pu1["w"], pu1["b"], pu1["bn"])
    U1A = _convT_cols(wu1[:, :, :c1, :], h2)
    U1B = _convT_cols(wu1[:, :, c1:, :], h2)
    BU1 = _tile_cols(bu1, h1)
    pu0 = params["up"][0]                    # used second: cat(8+8) -> 3
    wu0, bu0 = _fold_bn(pu0["w"], pu0["b"], pu0["bn"])
    U0A = _convT_cols(wu0[:, :, :c0, :], h1)
    U0B = _convT_cols(wu0[:, :, c0:, :], h1)
    BU0 = _tile_cols(bu0, hh)

    # constant row-selection / shift / interleave matrices
    S2A, S2B = _row_select(h1, hh, 2, 1), _row_select(h2, h1, 2, 1)
    S1 = _row_select(h2, h2, 1, 1)
    SH4, SH8 = _shift_up(h2), _shift_up(h1)
    P8, P16 = _interleave(h2), _interleave(h1)

    consts = [S2A, S2B, S1, SH4, SH8, P8, P16,
              W0, B0, W1, B1,
              RS1, RT1, WRA, BRA, RS2, RT2, WRB, BRB,
              U1A, U1B, BU1, U0A, U0B, BU0]

    out_m = pl.pallas_call(
        _segresnet_kernel,
        out_shape=jax.ShapeDtypeStruct((n, hh, ww * cout), jnp.float32),
        grid=(n,),
        in_specs=[pl.BlockSpec((1, hh, ww * cin), lambda b: (b, 0, 0))]
                 + [_const_spec(c) for c in consts],
        out_specs=pl.BlockSpec((1, hh, ww * cout), lambda b: (b, 0, 0)),
        compiler_params=pltpu.CompilerParams(
            dimension_semantics=("parallel",)),
    )(x_m, *consts)

    out = out_m.reshape(n, hh, ww, cout)     # merged -> NHWC
    return jnp.transpose(out, (0, 3, 1, 2))  # NHWC -> NCHW


# ------------------------------------------------ deterministic parameters --
def init_params(key, in_channels, out_channels, channels):
    n_conv = 2 * len(channels) + 2
    keys = jax.random.split(key, n_conv)
    kit = iter(range(n_conv))

    def conv_p(k, cin, cout):
        kw, kb = jax.random.split(k)
        w = jax.random.normal(kw, (3, 3, cin, cout), jnp.float32) * ((9.0 * cin) ** -0.5)
        b = jax.random.normal(kb, (cout,), jnp.float32) * 0.01
        return w, b

    def bn_p(c):
        # PyTorch BatchNorm defaults: gamma=1, beta=0, running_mean=0, running_var=1
        return (jnp.ones((c,), jnp.float32), jnp.zeros((c,), jnp.float32),
                jnp.zeros((c,), jnp.float32), jnp.ones((c,), jnp.float32))

    down, up = [], []
    for i in range(len(channels)):
        cin = in_channels if i == 0 else channels[i - 1]
        cout = channels[i]
        w, b = conv_p(keys[next(kit)], cin, cout)
        down.append({"w": w, "b": b, "bn": bn_p(cout)})

    for i in range(len(channels)):
        cin_up = channels[0] if i == 0 else channels[i]
        cout_up = out_channels if i == 0 else channels[i - 1]
        w, b = conv_p(keys[next(kit)], 2 * cin_up, cout_up)   # factor=2 ('cat')
        up.append({"w": w, "b": b, "bn": bn_p(cout_up)})

    cb = channels[-1]
    w1, b1 = conv_p(keys[next(kit)], cb, cb)
    w2, b2 = conv_p(keys[next(kit)], cb, cb)
    inter = {"n1": bn_p(cb), "w1": w1, "b1": b1,
             "n2": bn_p(cb), "w2": w2, "b2": b2}

    return {"down": down, "up": up, "inter": inter}


# ---------------------------------------------------------------------------
if __name__ == "__main__":
    image_size = 16
    in_channels, out_channels = 4, 3
    channels = (8, 16)

    key = jax.random.PRNGKey(0)
    pkey, xkey = jax.random.split(key)
    params = init_params(pkey, in_channels, out_channels, channels)
    x_in = jax.random.normal(xkey, (2, in_channels, image_size, image_size),
                             jnp.float32)

    fwd = jax.jit(segresnet_forward)
    out = jax.block_until_ready(fwd(params, x_in))

    assert out.shape == (2, out_channels, image_size, image_size), out.shape
    assert bool(jnp.all(jnp.isfinite(out)))
    print("KERNEL_OK")
</pallas_src>

<mosaic_0001>
module attributes {stable_mosaic.version = 11 : i64} {
  func.func @_segresnet_kernel(%arg0: i32, %arg1: memref<1x16x64xf32, #tpu.memory_space<vmem>>, %arg2: memref<3x8x16xf32, #tpu.memory_space<vmem>>, %arg3: memref<3x4x8xf32, #tpu.memory_space<vmem>>, %arg4: memref<3x4x4xf32, #tpu.memory_space<vmem>>, %arg5: memref<4x4xf32, #tpu.memory_space<vmem>>, %arg6: memref<8x8xf32, #tpu.memory_space<vmem>>, %arg7: memref<2x8x4xf32, #tpu.memory_space<vmem>>, %arg8: memref<2x16x8xf32, #tpu.memory_space<vmem>>, %arg9: memref<3x64x64xf32, #tpu.memory_space<vmem>>, %arg10: memref<1x64xf32, #tpu.memory_space<vmem>>, %arg11: memref<3x64x64xf32, #tpu.memory_space<vmem>>, %arg12: memref<1x64xf32, #tpu.memory_space<vmem>>, %arg13: memref<1x64xf32, #tpu.memory_space<vmem>>, %arg14: memref<1x64xf32, #tpu.memory_space<vmem>>, %arg15: memref<3x64x64xf32, #tpu.memory_space<vmem>>, %arg16: memref<1x64xf32, #tpu.memory_space<vmem>>, %arg17: memref<1x64xf32, #tpu.memory_space<vmem>>, %arg18: memref<1x64xf32, #tpu.memory_space<vmem>>, %arg19: memref<3x64x64xf32, #tpu.memory_space<vmem>>, %arg20: memref<1x64xf32, #tpu.memory_space<vmem>>, %arg21: memref<3x64x64xf32, #tpu.memory_space<vmem>>, %arg22: memref<3x64x64xf32, #tpu.memory_space<vmem>>, %arg23: memref<1x64xf32, #tpu.memory_space<vmem>>, %arg24: memref<3x64x48xf32, #tpu.memory_space<vmem>>, %arg25: memref<3x64x48xf32, #tpu.memory_space<vmem>>, %arg26: memref<1x48xf32, #tpu.memory_space<vmem>>, %arg27: memref<1x16x48xf32, #tpu.memory_space<vmem>>) attributes {dimension_semantics = [#tpu.dimension_semantics<parallel>], iteration_bounds = array<i64: 2>, scalar_prefetch = 0 : i64, scratch_operands = 0 : i64, tpu.core_type = #tpu.core_type<tc>, window_params = [{transform_indices = @transform_0, window_bounds = array<i64: 1, 16, 64>}, {pipeline_mode = #tpu.pipeline_mode<synchronous>, transform_indices = @transform_1, window_bounds = array<i64: 3, 8, 16>}, {pipeline_mode = #tpu.pipeline_mode<synchronous>, transform_indices = @transform_2, window_bounds = array<i64: 3, 4, 8>}, {pipeline_mode = #tpu.pipeline_mode<synchronous>, transform_indices = @transform_3, window_bounds = array<i64: 3, 4, 4>}, {pipeline_mode = #tpu.pipeline_mode<synchronous>, transform_indices = @transform_4, window_bounds = array<i64: 4, 4>}, {pipeline_mode = #tpu.pipeline_mode<synchronous>, transform_indices = @transform_5, window_bounds = array<i64: 8, 8>}, {pipeline_mode = #tpu.pipeline_mode<synchronous>, transform_indices = @transform_6, window_bounds = array<i64: 2, 8, 4>}, {pipeline_mode = #tpu.pipeline_mode<synchronous>, transform_indices = @transform_7, window_bounds = array<i64: 2, 16, 8>}, {pipeline_mode = #tpu.pipeline_mode<synchronous>, transform_indices = @transform_8, window_bounds = array<i64: 3, 64, 64>}, {pipeline_mode = #tpu.pipeline_mode<synchronous>, transform_indices = @transform_9, window_bounds = array<i64: 1, 64>}, {pipeline_mode = #tpu.pipeline_mode<synchronous>, transform_indices = @transform_10, window_bounds = array<i64: 3, 64, 64>}, {pipeline_mode = #tpu.pipeline_mode<synchronous>, transform_indices = @transform_11, window_bounds = array<i64: 1, 64>}, {pipeline_mode = #tpu.pipeline_mode<synchronous>, transform_indices = @transform_12, window_bounds = array<i64: 1, 64>}, {pipeline_mode = #tpu.pipeline_mode<synchronous>, transform_indices = @transform_13, window_bounds = array<i64: 1, 64>}, {pipeline_mode = #tpu.pipeline_mode<synchronous>, transform_indices = @transform_14, window_bounds = array<i64: 3, 64, 64>}, {pipeline_mode = #tpu.pipeline_mode<synchronous>, transform_indices = @transform_15, window_bounds = array<i64: 1, 64>}, {pipeline_mode = #tpu.pipeline_mode<synchronous>, transform_indices = @transform_16, window_bounds = array<i64: 1, 64>}, {pipeline_mode = #tpu.pipeline_mode<synchronous>, transform_indices = @transform_17, window_bounds = array<i64: 1, 64>}, {pipeline_mode = #tpu.pipeline_mode<synchronous>, transform_indices = @transform_18, window_bounds = array<i64: 3, 64, 64>}, {pipeline_mode = #tpu.pipeline_mode<synchronous>, transform_indices = @transform_19, window_bounds = array<i64: 1, 64>}, {pipeline_mode = #tpu.pipeline_mode<synchronous>, transform_indices = @transform_20, window_bounds = array<i64: 3, 64, 64>}, {pipeline_mode = #tpu.pipeline_mode<synchronous>, transform_indices = @transform_21, window_bounds = array<i64: 3, 64, 64>}, {pipeline_mode = #tpu.pipeline_mode<synchronous>, transform_indices = @transform_22, window_bounds = array<i64: 1, 64>}, {pipeline_mode = #tpu.pipeline_mode<synchronous>, transform_indices = @transform_23, window_bounds = array<i64: 3, 64, 48>}, {pipeline_mode = #tpu.pipeline_mode<synchronous>, transform_indices = @transform_24, window_bounds = array<i64: 3, 64, 48>}, {pipeline_mode = #tpu.pipeline_mode<synchronous>, transform_indices = @transform_25, window_bounds = array<i64: 1, 48>}, {transform_indices = @transform_26, window_bounds = array<i64: 1, 16, 48>}]} {
    %c0 = arith.constant 0 : index
    %c0_0 = arith.constant 0 : index
    %c0_1 = arith.constant 0 : index
    %0 = vector.load %arg1[%c0, %c0_0, %c0_1] : memref<1x16x64xf32, #tpu.memory_space<vmem>>, vector<1x16x64xf32>
    %1 = vector.shape_cast %0 : vector<1x16x64xf32> to vector<16x64xf32>
    %cst = arith.constant 0.000000e+00 : f32
    %2 = vector.broadcast %cst : f32 to vector<8x64xf32>
    %c0_2 = arith.constant 0 : index
    %c0_3 = arith.constant 0 : index
    %c0_4 = arith.constant 0 : index
    %3 = vector.load %arg2[%c0_2, %c0_3, %c0_4] : memref<3x8x16xf32, #tpu.memory_space<vmem>>, vector<1x8x16xf32>
    %4 = vector.shape_cast %3 : vector<1x8x16xf32> to vector<8x16xf32>
    %cst_5 = arith.constant dense<0.000000e+00> : vector<8x64xf32>
    %5 = tpu.matmul %4, %1, %cst_5 {dimension_numbers = #tpu.dot_dimension_numbers<[1], [0], [0], [1], [0, 0, 1, 1], [], []>} : vector<8x16xf32>, vector<16x64xf32>, vector<8x64xf32> -> vector<8x64xf32>
    %c0_6 = arith.constant 0 : index
    %c0_7 = arith.constant 0 : index
    %c0_8 = arith.constant 0 : index
    %6 = vector.load %arg9[%c0_6, %c0_7, %c0_8] : memref<3x64x64xf32, #tpu.memory_space<vmem>>, vector<1x64x64xf32>
    %7 = vector.shape_cast %6 : vector<1x64x64xf32> to vector<64x64xf32>
    %cst_9 = arith.constant dense<0.000000e+00> : vector<8x64xf32>
    %8 = tpu.matmul %5, %7, %cst_9 {dimension_numbers = #tpu.dot_dimension_numbers<[1], [0], [0], [1], [0, 0, 1, 1], [], []>} : vector<8x64xf32>, vector<64x64xf32>, vector<8x64xf32> -> vector<8x64xf32>
    %9 = arith.addf %2, %8 : vector<8x64xf32>
    %c1 = arith.constant 1 : index
    %c0_10 = arith.constant 0 : index
    %c0_11 = arith.constant 0 : index
    %10 = vector.load %arg2[%c1, %c0_10, %c0_11] : memref<3x8x16xf32, #tpu.memory_space<vmem>>, vector<1x8x16xf32>
    %11 = vector.shape_cast %10 : vector<1x8x16xf32> to vector<8x16xf32>
    %cst_12 = arith.constant dense<0.000000e+00> : vector<8x64xf32>
    %12 = tpu.matmul %11, %1, %cst_12 {dimension_numbers = #tpu.dot_dimension_numbers<[1], [0], [0], [1], [0, 0, 1, 1], [], []>} : vector<8x16xf32>, vector<16x64xf32>, vector<8x64xf32> -> vector<8x64xf32>
    %c1_13 = arith.constant 1 : index
    %c0_14 = arith.constant 0 : index
    %c0_15 = arith.constant 0 : index
    %13 = vector.load %arg9[%c1_13, %c0_14, %c0_15] : memref<3x64x64xf32, #tpu.memory_space<vmem>>, vector<1x64x64xf32>
    %14 = vector.shape_cast %13 : vector<1x64x64xf32> to vector<64x64xf32>
    %cst_16 = arith.constant dense<0.000000e+00> : vector<8x64xf32>
    %15 = tpu.matmul %12, %14, %cst_16 {dimension_numbers = #tpu.dot_dimension_numbers<[1], [0], [0], [1], [0, 0, 1, 1], [], []>} : vector<8x64xf32>, vector<64x64xf32>, vector<8x64xf32> -> vector<8x64xf32>
    %16 = arith.addf %9, %15 : vector<8x64xf32>
    %c2 = arith.constant 2 : index
    %c0_17 = arith.constant 0 : index
    %c0_18 = arith.constant 0 : index
    %17 = vector.load %arg2[%c2, %c0_17, %c0_18] : memref<3x8x16xf32, #tpu.memory_space<vmem>>, vector<1x8x16xf32>
    %18 = vector.shape_cast %17 : vector<1x8x16xf32> to vector<8x16xf32>
    %cst_19 = arith.constant dense<0.000000e+00> : vector<8x64xf32>
    %19 = tpu.matmul %18, %1, %cst_19 {dimension_numbers = #tpu.dot_dimension_numbers<[1], [0], [0], [1], [0, 0, 1, 1], [], []>} : vector<8x16xf32>, vector<16x64xf32>, vector<8x64xf32> -> vector<8x64xf32>
    %c2_20 = arith.constant 2 : index
    %c0_21 = arith.constant 0 : index
    %c0_22 = arith.constant 0 : index
    %20 = vector.load %arg9[%c2_20, %c0_21, %c0_22] : memref<3x64x64xf32, #tpu.memory_space<vmem>>, vector<1x64x64xf32>
    %21 = vector.shape_cast %20 : vector<1x64x64xf32> to vector<64x64xf32>
    %cst_23 = arith.constant dense<0.000000e+00> : vector<8x64xf32>
    %22 = tpu.matmul %19, %21, %cst_23 {dimension_numbers = #tpu.dot_dimension_numbers<[1], [0], [0], [1], [0, 0, 1, 1], [], []>} : vector<8x64xf32>, vector<64x64xf32>, vector<8x64xf32> -> vector<8x64xf32>
    %23 = arith.addf %16, %22 : vector<8x64xf32>
    %c0_24 = arith.constant 0 : index
    %c0_25 = arith.constant 0 : index
    %24 = vector.load %arg10[%c0_24, %c0_25] : memref<1x64xf32, #tpu.memory_space<vmem>>, vector<1x64xf32>
    %25 = vector.broadcast %24 : vector<1x64xf32> to vector<8x64xf32>
    %26 = arith.addf %23, %25 : vector<8x64xf32>
    %cst_26 = arith.constant 0.000000e+00 : f32
    %27 = vector.broadcast %cst_26 : f32 to vector<8x64xf32>
    %28 = arith.maximumf %26, %27 : vector<8x64xf32>
    %cst_27 = arith.constant 0.000000e+00 : f32
    %29 = vector.broadcast %cst_27 : f32 to vector<4x64xf32>
    %c0_28 = arith.constant 0 : index
    %c0_29 = arith.constant 0 : index
    %c0_30 = arith.constant 0 : index
    %30 = vector.load %arg3[%c0_28, %c0_29, %c0_30] : memref<3x4x8xf32, #tpu.memory_space<vmem>>, vector<1x4x8xf32>
    %31 = vector.shape_cast %30 : vector<1x4x8xf32> to vector<4x8xf32>
    %cst_31 = arith.constant dense<0.000000e+00> : vector<4x64xf32>
    %32 = tpu.matmul %31, %28, %cst_31 {dimension_numbers = #tpu.dot_dimension_numbers<[1], [0], [0], [1], [0, 0, 1, 1], [], []>} : vector<4x8xf32>, vector<8x64xf32>, vector<4x64xf32> -> vector<4x64xf32>
    %c0_32 = arith.constant 0 : index
    %c0_33 = arith.constant 0 : index
    %c0_34 = arith.constant 0 : index
    %33 = vector.load %arg11[%c0_32, %c0_33, %c0_34] : memref<3x64x64xf32, #tpu.memory_space<vmem>>, vector<1x64x64xf32>
    %34 = vector.shape_cast %33 : vector<1x64x64xf32> to vector<64x64xf32>
    %cst_35 = arith.constant dense<0.000000e+00> : vector<4x64xf32>
    %35 = tpu.matmul %32, %34, %cst_35 {dimension_numbers = #tpu.dot_dimension_numbers<[1], [0], [0], [1], [0, 0, 1, 1], [], []>} : vector<4x64xf32>, vector<64x64xf32>, vector<4x64xf32> -> vector<4x64xf32>
    %36 = arith.addf %29, %35 : vector<4x64xf32>
    %c1_36 = arith.constant 1 : index
    %c0_37 = arith.constant 0 : index
    %c0_38 = arith.constant 0 : index
    %37 = vector.load %arg3[%c1_36, %c0_37, %c0_38] : memref<3x4x8xf32, #tpu.memory_space<vmem>>, vector<1x4x8xf32>
    %38 = vector.shape_cast %37 : vector<1x4x8xf32> to vector<4x8xf32>
    %cst_39 = arith.constant dense<0.000000e+00> : vector<4x64xf32>
    %39 = tpu.matmul %38, %28, %cst_39 {dimension_numbers = #tpu.dot_dimension_numbers<[1], [0], [0], [1], [0, 0, 1, 1], [], []>} : vector<4x8xf32>, vector<8x64xf32>, vector<4x64xf32> -> vector<4x64xf32>
    %c1_40 = arith.constant 1 : index
    %c0_41 = arith.constant 0 : index
    %c0_42 = arith.constant 0 : index
    %40 = vector.load %arg11[%c1_40, %c0_41, %c0_42] : memref<3x64x64xf32, #tpu.memory_space<vmem>>, vector<1x64x64xf32>
    %41 = vector.shape_cast %40 : vector<1x64x64xf32> to vector<64x64xf32>
    %cst_43 = arith.constant dense<0.000000e+00> : vector<4x64xf32>
    %42 = tpu.matmul %39, %41, %cst_43 {dimension_numbers = #tpu.dot_dimension_numbers<[1], [0], [0], [1], [0, 0, 1, 1], [], []>} : vector<4x64xf32>, vector<64x64xf32>, vector<4x64xf32> -> vector<4x64xf32>
    %43 = arith.addf %36, %42 : vector<4x64xf32>
    %c2_44 = arith.constant 2 : index
    %c0_45 = arith.constant 0 : index
    %c0_46 = arith.constant 0 : index
    %44 = vector.load %arg3[%c2_44, %c0_45, %c0_46] : memref<3x4x8xf32, #tpu.memory_space<vmem>>, vector<1x4x8xf32>
    %45 = vector.shape_cast %44 : vector<1x4x8xf32> to vector<4x8xf32>
    %cst_47 = arith.constant dense<0.000000e+00> : vector<4x64xf32>
    %46 = tpu.matmul %45, %28, %cst_47 {dimension_numbers = #tpu.dot_dimension_numbers<[1], [0], [0], [1], [0, 0, 1, 1], [], []>} : vector<4x8xf32>, vector<8x64xf32>, vector<4x64xf32> -> vector<4x64xf32>
    %c2_48 = arith.constant 2 : index
    %c0_49 = arith.constant 0 : index
    %c0_50 = arith.constant 0 : index
    %47 = vector.load %arg11[%c2_48, %c0_49, %c0_50] : memref<3x64x64xf32, #tpu.memory_space<vmem>>, vector<1x64x64xf32>
    %48 = vector.shape_cast %47 : vector<1x64x64xf32> to vector<64x64xf32>
    %cst_51 = arith.constant dense<0.000000e+00> : vector<4x64xf32>
    %49 = tpu.matmul %46, %48, %cst_51 {dimension_numbers = #tpu.dot_dimension_numbers<[1], [0], [0], [1], [0, 0, 1, 1], [], []>} : vector<4x64xf32>, vector<64x64xf32>, vector<4x64xf32> -> vector<4x64xf32>
    %50 = arith.addf %43, %49 : vector<4x64xf32>
    %c0_52 = arith.constant 0 : index
    %c0_53 = arith.constant 0 : index
    %51 = vector.load %arg12[%c0_52, %c0_53] : memref<1x64xf32, #tpu.memory_space<vmem>>, vector<1x64xf32>
    %52 = vector.broadcast %51 : vector<1x64xf32> to vector<4x64xf32>
    %53 = arith.addf %50, %52 : vector<4x64xf32>
    %cst_54 = arith.constant 0.000000e+00 : f32
    %54 = vector.broadcast %cst_54 : f32 to vector<4x64xf32>
    %55 = arith.maximumf %53, %54 : vector<4x64xf32>
    %c0_55 = arith.constant 0 : index
    %c0_56 = arith.constant 0 : index
    %56 = vector.load %arg13[%c0_55, %c0_56] : memref<1x64xf32, #tpu.memory_space<vmem>>, vector<1x64xf32>
    %57 = vector.broadcast %56 : vector<1x64xf32> to vector<4x64xf32>
    %58 = arith.mulf %55, %57 : vector<4x64xf32>
    %c0_57 = arith.constant 0 : index
    %c0_58 = arith.constant 0 : index
    %59 = vector.load %arg14[%c0_57, %c0_58] : memref<1x64xf32, #tpu.memory_space<vmem>>, vector<1x64xf32>
    %60 = vector.broadcast %59 : vector<1x64xf32> to vector<4x64xf32>
    %61 = arith.addf %58, %60 : vector<4x64xf32>
    %cst_59 = arith.constant 0.000000e+00 : f32
    %62 = vector.broadcast %cst_59 : f32 to vector<4x64xf32>
    %63 = arith.maximumf %61, %62 : vector<4x64xf32>
    %cst_60 = arith.constant 0.000000e+00 : f32
    %64 = vector.broadcast %cst_60 : f32 to vector<4x64xf32>
    %c0_61 = arith.constant 0 : index
    %c0_62 = arith.constant 0 : index
    %c0_63 = arith.constant 0 : index
    %65 = vector.load %arg4[%c0_61, %c0_62, %c0_63] : memref<3x4x4xf32, #tpu.memory_space<vmem>>, vector<1x4x4xf32>
    %66 = vector.shape_cast %65 : vector<1x4x4xf32> to vector<4x4xf32>
    %cst_64 = arith.constant dense<0.000000e+00> : vector<4x64xf32>
    %67 = tpu.matmul %66, %63, %cst_64 {dimension_numbers = #tpu.dot_dimension_numbers<[1], [0], [0], [1], [0, 0, 1, 1], [], []>} : vector<4x4xf32>, vector<4x64xf32>, vector<4x64xf32> -> vector<4x64xf32>
    %c0_65 = arith.constant 0 : index
    %c0_66 = arith.constant 0 : index
    %c0_67 = arith.constant 0 : index
    %68 = vector.load %arg15[%c0_65, %c0_66, %c0_67] : memref<3x64x64xf32, #tpu.memory_space<vmem>>, vector<1x64x64xf32>
    %69 = vector.shape_cast %68 : vector<1x64x64xf32> to vector<64x64xf32>
    %cst_68 = arith.constant dense<0.000000e+00> : vector<4x64xf32>
    %70 = tpu.matmul %67, %69, %cst_68 {dimension_numbers = #tpu.dot_dimension_numbers<[1], [0], [0], [1], [0, 0, 1, 1], [], []>} : vector<4x64xf32>, vector<64x64xf32>, vector<4x64xf32> -> vector<4x64xf32>
    %71 = arith.addf %64, %70 : vector<4x64xf32>
    %c1_69 = arith.constant 1 : index
    %c0_70 = arith.constant 0 : index
    %c0_71 = arith.constant 0 : index
    %72 = vector.load %arg4[%c1_69, %c0_70, %c0_71] : memref<3x4x4xf32, #tpu.memory_space<vmem>>, vector<1x4x4xf32>
    %73 = vector.shape_cast %72 : vector<1x4x4xf32> to vector<4x4xf32>
    %cst_72 = arith.constant dense<0.000000e+00> : vector<4x64xf32>
    %74 = tpu.matmul %73, %63, %cst_72 {dimension_numbers = #tpu.dot_dimension_numbers<[1], [0], [0], [1], [0, 0, 1, 1], [], []>} : vector<4x4xf32>, vector<4x64xf32>, vector<4x64xf32> -> vector<4x64xf32>
    %c1_73 = arith.constant 1 : index
    %c0_74 = arith.constant 0 : index
    %c0_75 = arith.constant 0 : index
    %75 = vector.load %arg15[%c1_73, %c0_74, %c0_75] : memref<3x64x64xf32, #tpu.memory_space<vmem>>, vector<1x64x64xf32>
    %76 = vector.shape_cast %75 : vector<1x64x64xf32> to vector<64x64xf32>
    %cst_76 = arith.constant dense<0.000000e+00> : vector<4x64xf32>
    %77 = tpu.matmul %74, %76, %cst_76 {dimension_numbers = #tpu.dot_dimension_numbers<[1], [0], [0], [1], [0, 0, 1, 1], [], []>} : vector<4x64xf32>, vector<64x64xf32>, vector<4x64xf32> -> vector<4x64xf32>
    %78 = arith.addf %71, %77 : vector<4x64xf32>
    %c2_77 = arith.constant 2 : index
    %c0_78 = arith.constant 0 : index
    %c0_79 = arith.constant 0 : index
    %79 = vector.load %arg4[%c2_77, %c0_78, %c0_79] : memref<3x4x4xf32, #tpu.memory_space<vmem>>, vector<1x4x4xf32>
    %80 = vector.shape_cast %79 : vector<1x4x4xf32> to vector<4x4xf32>
    %cst_80 = arith.constant dense<0.000000e+00> : vector<4x64xf32>
    %81 = tpu.matmul %80, %63, %cst_80 {dimension_numbers = #tpu.dot_dimension_numbers<[1], [0], [0], [1], [0, 0, 1, 1], [], []>} : vector<4x4xf32>, vector<4x64xf32>, vector<4x64xf32> -> vector<4x64xf32>
    %c2_81 = arith.constant 2 : index
    %c0_82 = arith.constant 0 : index
    %c0_83 = arith.constant 0 : index
    %82 = vector.load %arg15[%c2_81, %c0_82, %c0_83] : memref<3x64x64xf32, #tpu.memory_space<vmem>>, vector<1x64x64xf32>
    %83 = vector.shape_cast %82 : vector<1x64x64xf32> to vector<64x64xf32>
    %cst_84 = arith.constant dense<0.000000e+00> : vector<4x64xf32>
    %84 = tpu.matmul %81, %83, %cst_84 {dimension_numbers = #tpu.dot_dimension_numbers<[1], [0], [0], [1], [0, 0, 1, 1], [], []>} : vector<4x64xf32>, vector<64x64xf32>, vector<4x64xf32> -> vector<4x64xf32>
    %85 = arith.addf %78, %84 : vector<4x64xf32>
    %c0_85 = arith.constant 0 : index
    %c0_86 = arith.constant 0 : index
    %86 = vector.load %arg16[%c0_85, %c0_86] : memref<1x64xf32, #tpu.memory_space<vmem>>, vector<1x64xf32>
    %87 = vector.broadcast %86 : vector<1x64xf32> to vector<4x64xf32>
    %88 = arith.addf %85, %87 : vector<4x64xf32>
    %c0_87 = arith.constant 0 : index
    %c0_88 = arith.constant 0 : index
    %89 = vector.load %arg17[%c0_87, %c0_88] : memref<1x64xf32, #tpu.memory_space<vmem>>, vector<1x64xf32>
    %90 = vector.broadcast %89 : vector<1x64xf32> to vector<4x64xf32>
    %91 = arith.mulf %88, %90 : vector<4x64xf32>
    %c0_89 = arith.constant 0 : index
    %c0_90 = arith.constant 0 : index
    %92 = vector.load %arg18[%c0_89, %c0_90] : memref<1x64xf32, #tpu.memory_space<vmem>>, vector<1x64xf32>
    %93 = vector.broadcast %92 : vector<1x64xf32> to vector<4x64xf32>
    %94 = arith.addf %91, %93 : vector<4x64xf32>
    %cst_91 = arith.constant 0.000000e+00 : f32
    %95 = vector.broadcast %cst_91 : f32 to vector<4x64xf32>
    %96 = arith.maximumf %94, %95 : vector<4x64xf32>
    %cst_92 = arith.constant 0.000000e+00 : f32
    %97 = vector.broadcast %cst_92 : f32 to vector<4x64xf32>
    %c0_93 = arith.constant 0 : index
    %c0_94 = arith.constant 0 : index
    %c0_95 = arith.constant 0 : index
    %98 = vector.load %arg4[%c0_93, %c0_94, %c0_95] : memref<3x4x4xf32, #tpu.memory_space<vmem>>, vector<1x4x4xf32>
    %99 = vector.shape_cast %98 : vector<1x4x4xf32> to vector<4x4xf32>
    %cst_96 = arith.constant dense<0.000000e+00> : vector<4x64xf32>
    %100 = tpu.matmul %99, %96, %cst_96 {dimension_numbers = #tpu.dot_dimension_numbers<[1], [0], [0], [1], [0, 0, 1, 1], [], []>} : vector<4x4xf32>, vector<4x64xf32>, vector<4x64xf32> -> vector<4x64xf32>
    %c0_97 = arith.constant 0 : index
    %c0_98 = arith.constant 0 : index
    %c0_99 = arith.constant 0 : index
    %101 = vector.load %arg19[%c0_97, %c0_98, %c0_99] : memref<3x64x64xf32, #tpu.memory_space<vmem>>, vector<1x64x64xf32>
    %102 = vector.shape_cast %101 : vector<1x64x64xf32> to vector<64x64xf32>
    %cst_100 = arith.constant dense<0.000000e+00> : vector<4x64xf32>
    %103 = tpu.matmul %100, %102, %cst_100 {dimension_numbers = #tpu.dot_dimension_numbers<[1], [0], [0], [1], [0, 0, 1, 1], [], []>} : vector<4x64xf32>, vector<64x64xf32>, vector<4x64xf32> -> vector<4x64xf32>
    %104 = arith.addf %97, %103 : vector<4x64xf32>
    %c1_101 = arith.constant 1 : index
    %c0_102 = arith.constant 0 : index
    %c0_103 = arith.constant 0 : index
    %105 = vector.load %arg4[%c1_101, %c0_102, %c0_103] : memref<3x4x4xf32, #tpu.memory_space<vmem>>, vector<1x4x4xf32>
    %106 = vector.shape_cast %105 : vector<1x4x4xf32> to vector<4x4xf32>
    %cst_104 = arith.constant dense<0.000000e+00> : vector<4x64xf32>
    %107 = tpu.matmul %106, %96, %cst_104 {dimension_numbers = #tpu.dot_dimension_numbers<[1], [0], [0], [1], [0, 0, 1, 1], [], []>} : vector<4x4xf32>, vector<4x64xf32>, vector<4x64xf32> -> vector<4x64xf32>
    %c1_105 = arith.constant 1 : index
    %c0_106 = arith.constant 0 : index
    %c0_107 = arith.constant 0 : index
    %108 = vector.load %arg19[%c1_105, %c0_106, %c0_107] : memref<3x64x64xf32, #tpu.memory_space<vmem>>, vector<1x64x64xf32>
    %109 = vector.shape_cast %108 : vector<1x64x64xf32> to vector<64x64xf32>
    %cst_108 = arith.constant dense<0.000000e+00> : vector<4x64xf32>
    %110 = tpu.matmul %107, %109, %cst_108 {dimension_numbers = #tpu.dot_dimension_numbers<[1], [0], [0], [1], [0, 0, 1, 1], [], []>} : vector<4x64xf32>, vector<64x64xf32>, vector<4x64xf32> -> vector<4x64xf32>
    %111 = arith.addf %104, %110 : vector<4x64xf32>
    %c2_109 = arith.constant 2 : index
    %c0_110 = arith.constant 0 : index
    %c0_111 = arith.constant 0 : index
    %112 = vector.load %arg4[%c2_109, %c0_110, %c0_111] : memref<3x4x4xf32, #tpu.memory_space<vmem>>, vector<1x4x4xf32>
    %113 = vector.shape_cast %112 : vector<1x4x4xf32> to vector<4x4xf32>
    %cst_112 = arith.constant dense<0.000000e+00> : vector<4x64xf32>
    %114 = tpu.matmul %113, %96, %cst_112 {dimension_numbers = #tpu.dot_dimension_numbers<[1], [0], [0], [1], [0, 0, 1, 1], [], []>} : vector<4x4xf32>, vector<4x64xf32>, vector<4x64xf32> -> vector<4x64xf32>
    %c2_113 = arith.constant 2 : index
    %c0_114 = arith.constant 0 : index
    %c0_115 = arith.constant 0 : index
    %115 = vector.load %arg19[%c2_113, %c0_114, %c0_115] : memref<3x64x64xf32, #tpu.memory_space<vmem>>, vector<1x64x64xf32>
    %116 = vector.shape_cast %115 : vector<1x64x64xf32> to vector<64x64xf32>
    %cst_116 = arith.constant dense<0.000000e+00> : vector<4x64xf32>
    %117 = tpu.matmul %114, %116, %cst_116 {dimension_numbers = #tpu.dot_dimension_numbers<[1], [0], [0], [1], [0, 0, 1, 1], [], []>} : vector<4x64xf32>, vector<64x64xf32>, vector<4x64xf32> -> vector<4x64xf32>
    %118 = arith.addf %111, %117 : vector<4x64xf32>
    %c0_117 = arith.constant 0 : index
    %c0_118 = arith.constant 0 : index
    %119 = vector.load %arg20[%c0_117, %c0_118] : memref<1x64xf32, #tpu.memory_space<vmem>>, vector<1x64xf32>
    %120 = vector.broadcast %119 : vector<1x64xf32> to vector<4x64xf32>
    %121 = arith.addf %118, %120 : vector<4x64xf32>
    %122 = arith.addf %121, %55 : vector<4x64xf32>
    %c0_119 = arith.constant 0 : index
    %c0_120 = arith.constant 0 : index
    %123 = vector.load %arg5[%c0_119, %c0_120] : memref<4x4xf32, #tpu.memory_space<vmem>>, vector<4x4xf32>
    %cst_121 = arith.constant dense<0.000000e+00> : vector<4x64xf32>
    %124 = tpu.matmul %123, %122, %cst_121 {dimension_numbers = #tpu.dot_dimension_numbers<[1], [0], [0], [1], [0, 0, 1, 1], [], []>} : vector<4x4xf32>, vector<4x64xf32>, vector<4x64xf32> -> vector<4x64xf32>
    %c0_122 = arith.constant 0 : index
    %c0_123 = arith.constant 0 : index
    %125 = vector.load %arg5[%c0_122, %c0_123] : memref<4x4xf32, #tpu.memory_space<vmem>>, vector<4x4xf32>
    %cst_124 = arith.constant dense<0.000000e+00> : vector<4x64xf32>
    %126 = tpu.matmul %125, %55, %cst_124 {dimension_numbers = #tpu.dot_dimension_numbers<[1], [0], [0], [1], [0, 0, 1, 1], [], []>} : vector<4x4xf32>, vector<4x64xf32>, vector<4x64xf32> -> vector<4x64xf32>
    %c1_125 = arith.constant 1 : index
    %c0_126 = arith.constant 0 : index
    %c0_127 = arith.constant 0 : index
    %127 = vector.load %arg21[%c1_125, %c0_126, %c0_127] : memref<3x64x64xf32, #tpu.memory_space<vmem>>, vector<1x64x64xf32>
    %128 = vector.shape_cast %127 : vector<1x64x64xf32> to vector<64x64xf32>
    %cst_128 = arith.constant dense<0.000000e+00> : vector<4x64xf32>
    %129 = tpu.matmul %122, %128, %cst_128 {dimension_numbers = #tpu.dot_dimension_numbers<[1], [0], [0], [1], [0, 0, 1, 1], [], []>} : vector<4x64xf32>, vector<64x64xf32>, vector<4x64xf32> -> vector<4x64xf32>
    %c1_129 = arith.constant 1 : index
    %c0_130 = arith.constant 0 : index
    %c0_131 = arith.constant 0 : index
    %130 = vector.load %arg22[%c1_129, %c0_130, %c0_131] : memref<3x64x64xf32, #tpu.memory_space<vmem>>, vector<1x64x64xf32>
    %131 = vector.shape_cast %130 : vector<1x64x64xf32> to vector<64x64xf32>
    %cst_132 = arith.constant dense<0.000000e+00> : vector<4x64xf32>
    %132 = tpu.matmul %55, %131, %cst_132 {dimension_numbers = #tpu.dot_dimension_numbers<[1], [0], [0], [1], [0, 0, 1, 1], [], []>} : vector<4x64xf32>, vector<64x64xf32>, vector<4x64xf32> -> vector<4x64xf32>
    %133 = arith.addf %129, %132 : vector<4x64xf32>
    %c0_133 = arith.constant 0 : index
    %c0_134 = arith.constant 0 : index
    %c0_135 = arith.constant 0 : index
    %134 = vector.load %arg21[%c0_133, %c0_134, %c0_135] : memref<3x64x64xf32, #tpu.memory_space<vmem>>, vector<1x64x64xf32>
    %135 = vector.shape_cast %134 : vector<1x64x64xf32> to vector<64x64xf32>
    %cst_136 = arith.constant dense<0.000000e+00> : vector<4x64xf32>
    %136 = tpu.matmul %122, %135, %cst_136 {dimension_numbers = #tpu.dot_dimension_numbers<[1], [0], [0], [1], [0, 0, 1, 1], [], []>} : vector<4x64xf32>, vector<64x64xf32>, vector<4x64xf32> -> vector<4x64xf32>
    %c0_137 = arith.constant 0 : index
    %c0_138 = arith.constant 0 : index
    %c0_139 = arith.constant 0 : index
    %137 = vector.load %arg22[%c0_137, %c0_138, %c0_139] : memref<3x64x64xf32, #tpu.memory_space<vmem>>, vector<1x64x64xf32>
    %138 = vector.shape_cast %137 : vector<1x64x64xf32> to vector<64x64xf32>
    %cst_140 = arith.constant dense<0.000000e+00> : vector<4x64xf32>
    %139 = tpu.matmul %55, %138, %cst_140 {dimension_numbers = #tpu.dot_dimension_numbers<[1], [0], [0], [1], [0, 0, 1, 1], [], []>} : vector<4x64xf32>, vector<64x64xf32>, vector<4x64xf32> -> vector<4x64xf32>
    %140 = arith.addf %136, %139 : vector<4x64xf32>
    %c2_141 = arith.constant 2 : index
    %c0_142 = arith.constant 0 : index
    %c0_143 = arith.constant 0 : index
    %141 = vector.load %arg21[%c2_141, %c0_142, %c0_143] : memref<3x64x64xf32, #tpu.memory_space<vmem>>, vector<1x64x64xf32>
    %142 = vector.shape_cast %141 : vector<1x64x64xf32> to vector<64x64xf32>
    %cst_144 = arith.constant dense<0.000000e+00> : vector<4x64xf32>
    %143 = tpu.matmul %124, %142, %cst_144 {dimension_numbers = #tpu.dot_dimension_numbers<[1], [0], [0], [1], [0, 0, 1, 1], [], []>} : vector<4x64xf32>, vector<64x64xf32>, vector<4x64xf32> -> vector<4x64xf32>
    %144 = arith.addf %140, %143 : vector<4x64xf32>
    %c2_145 = arith.constant 2 : index
    %c0_146 = arith.constant 0 : index
    %c0_147 = arith.constant 0 : index
    %145 = vector.load %arg22[%c2_145, %c0_146, %c0_147] : memref<3x64x64xf32, #tpu.memory_space<vmem>>, vector<1x64x64xf32>
    %146 = vector.shape_cast %145 : vector<1x64x64xf32> to vector<64x64xf32>
    %cst_148 = arith.constant dense<0.000000e+00> : vector<4x64xf32>
    %147 = tpu.matmul %126, %146, %cst_148 {dimension_numbers = #tpu.dot_dimension_numbers<[1], [0], [0], [1], [0, 0, 1, 1], [], []>} : vector<4x64xf32>, vector<64x64xf32>, vector<4x64xf32> -> vector<4x64xf32>
    %148 = arith.addf %144, %147 : vector<4x64xf32>
    %c0_149 = arith.constant 0 : index
    %c0_150 = arith.constant 0 : index
    %c0_151 = arith.constant 0 : index
    %149 = vector.load %arg7[%c0_149, %c0_150, %c0_151] : memref<2x8x4xf32, #tpu.memory_space<vmem>>, vector<1x8x4xf32>
    %150 = vector.shape_cast %149 : vector<1x8x4xf32> to vector<8x4xf32>
    %cst_152 = arith.constant dense<0.000000e+00> : vector<8x64xf32>
    %151 = tpu.matmul %150, %133, %cst_152 {dimension_numbers = #tpu.dot_dimension_numbers<[1], [0], [0], [1], [0, 0, 1, 1], [], []>} : vector<8x4xf32>, vector<4x64xf32>, vector<8x64xf32> -> vector<8x64xf32>
    %c1_153 = arith.constant 1 : index
    %c0_154 = arith.constant 0 : index
    %c0_155 = arith.constant 0 : index
    %152 = vector.load %arg7[%c1_153, %c0_154, %c0_155] : memref<2x8x4xf32, #tpu.memory_space<vmem>>, vector<1x8x4xf32>
    %153 = vector.shape_cast %152 : vector<1x8x4xf32> to vector<8x4xf32>
    %cst_156 = arith.constant dense<0.000000e+00> : vector<8x64xf32>
    %154 = tpu.matmul %153, %148, %cst_156 {dimension_numbers = #tpu.dot_dimension_numbers<[1], [0], [0], [1], [0, 0, 1, 1], [], []>} : vector<8x4xf32>, vector<4x64xf32>, vector<8x64xf32> -> vector<8x64xf32>
    %155 = arith.addf %151, %154 : vector<8x64xf32>
    %c0_157 = arith.constant 0 : index
    %c0_158 = arith.constant 0 : index
    %156 = vector.load %arg23[%c0_157, %c0_158] : memref<1x64xf32, #tpu.memory_space<vmem>>, vector<1x64xf32>
    %157 = vector.broadcast %156 : vector<1x64xf32> to vector<8x64xf32>
    %158 = arith.addf %155, %157 : vector<8x64xf32>
    %cst_159 = arith.constant 0.000000e+00 : f32
    %159 = vector.broadcast %cst_159 : f32 to vector<8x64xf32>
    %160 = arith.maximumf %158, %159 : vector<8x64xf32>
    %c0_160 = arith.constant 0 : index
    %c0_161 = arith.constant 0 : index
    %161 = vector.load %arg6[%c0_160, %c0_161] : memref<8x8xf32, #tpu.memory_space<vmem>>, vector<8x8xf32>
    %cst_162 = arith.constant dense<0.000000e+00> : vector<8x64xf32>
    %162 = tpu.matmul %161, %160, %cst_162 {dimension_numbers = #tpu.dot_dimension_numbers<[1], [0], [0], [1], [0, 0, 1, 1], [], []>} : vector<8x8xf32>, vector<8x64xf32>, vector<8x64xf32> -> vector<8x64xf32>
    %c0_163 = arith.constant 0 : index
    %c0_164 = arith.constant 0 : index
    %163 = vector.load %arg6[%c0_163, %c0_164] : memref<8x8xf32, #tpu.memory_space<vmem>>, vector<8x8xf32>
    %cst_165 = arith.constant dense<0.000000e+00> : vector<8x64xf32>
    %164 = tpu.matmul %163, %28, %cst_165 {dimension_numbers = #tpu.dot_dimension_numbers<[1], [0], [0], [1], [0, 0, 1, 1], [], []>} : vector<8x8xf32>, vector<8x64xf32>, vector<8x64xf32> -> vector<8x64xf32>
    %c1_166 = arith.constant 1 : index
    %c0_167 = arith.constant 0 : index
    %c0_168 = arith.constant 0 : index
    %165 = vector.load %arg24[%c1_166, %c0_167, %c0_168] : memref<3x64x48xf32, #tpu.memory_space<vmem>>, vector<1x64x48xf32>
    %166 = vector.shape_cast %165 : vector<1x64x48xf32> to vector<64x48xf32>
    %cst_169 = arith.constant dense<0.000000e+00> : vector<8x48xf32>
    %167 = tpu.matmul %160, %166, %cst_169 {dimension_numbers = #tpu.dot_dimension_numbers<[1], [0], [0], [1], [0, 0, 1, 1], [], []>} : vector<8x64xf32>, vector<64x48xf32>, vector<8x48xf32> -> vector<8x48xf32>
    %c1_170 = arith.constant 1 : index
    %c0_171 = arith.constant 0 : index
    %c0_172 = arith.constant 0 : index
    %168 = vector.load %arg25[%c1_170, %c0_171, %c0_172] : memref<3x64x48xf32, #tpu.memory_space<vmem>>, vector<1x64x48xf32>
    %169 = vector.shape_cast %168 : vector<1x64x48xf32> to vector<64x48xf32>
    %cst_173 = arith.constant dense<0.000000e+00> : vector<8x48xf32>
    %170 = tpu.matmul %28, %169, %cst_173 {dimension_numbers = #tpu.dot_dimension_numbers<[1], [0], [0], [1], [0, 0, 1, 1], [], []>} : vector<8x64xf32>, vector<64x48xf32>, vector<8x48xf32> -> vector<8x48xf32>
    %171 = arith.addf %167, %170 : vector<8x48xf32>
    %c0_174 = arith.constant 0 : index
    %c0_175 = arith.constant 0 : index
    %c0_176 = arith.constant 0 : index
    %172 = vector.load %arg24[%c0_174, %c0_175, %c0_176] : memref<3x64x48xf32, #tpu.memory_space<vmem>>, vector<1x64x48xf32>
    %173 = vector.shape_cast %172 : vector<1x64x48xf32> to vector<64x48xf32>
    %cst_177 = arith.constant dense<0.000000e+00> : vector<8x48xf32>
    %174 = tpu.matmul %160, %173, %cst_177 {dimension_numbers = #tpu.dot_dimension_numbers<[1], [0], [0], [1], [0, 0, 1, 1], [], []>} : vector<8x64xf32>, vector<64x48xf32>, vector<8x48xf32> -> vector<8x48xf32>
    %c0_178 = arith.constant 0 : index
    %c0_179 = arith.constant 0 : index
    %c0_180 = arith.constant 0 : index
    %175 = vector.load %arg25[%c0_178, %c0_179, %c0_180] : memref<3x64x48xf32, #tpu.memory_space<vmem>>, vector<1x64x48xf32>
    %176 = vector.shape_cast %175 : vector<1x64x48xf32> to vector<64x48xf32>
    %cst_181 = arith.constant dense<0.000000e+00> : vector<8x48xf32>
    %177 = tpu.matmul %28, %176, %cst_181 {dimension_numbers = #tpu.dot_dimension_numbers<[1], [0], [0], [1], [0, 0, 1, 1], [], []>} : vector<8x64xf32>, vector<64x48xf32>, vector<8x48xf32> -> vector<8x48xf32>
    %178 = arith.addf %174, %177 : vector<8x48xf32>
    %c2_182 = arith.constant 2 : index
    %c0_183 = arith.constant 0 : index
    %c0_184 = arith.constant 0 : index
    %179 = vector.load %arg24[%c2_182, %c0_183, %c0_184] : memref<3x64x48xf32, #tpu.memory_space<vmem>>, vector<1x64x48xf32>
    %180 = vector.shape_cast %179 : vector<1x64x48xf32> to vector<64x48xf32>
    %cst_185 = arith.constant dense<0.000000e+00> : vector<8x48xf32>
    %181 = tpu.matmul %162, %180, %cst_185 {dimension_numbers = #tpu.dot_dimension_numbers<[1], [0], [0], [1], [0, 0, 1, 1], [], []>} : vector<8x64xf32>, vector<64x48xf32>, vector<8x48xf32> -> vector<8x48xf32>
    %182 = arith.addf %178, %181 : vector<8x48xf32>
    %c2_186 = arith.constant 2 : index
    %c0_187 = arith.constant 0 : index
    %c0_188 = arith.constant 0 : index
    %183 = vector.load %arg25[%c2_186, %c0_187, %c0_188] : memref<3x64x48xf32, #tpu.memory_space<vmem>>, vector<1x64x48xf32>
    %184 = vector.shape_cast %183 : vector<1x64x48xf32> to vector<64x48xf32>
    %cst_189 = arith.constant dense<0.000000e+00> : vector<8x48xf32>
    %185 = tpu.matmul %164, %184, %cst_189 {dimension_numbers = #tpu.dot_dimension_numbers<[1], [0], [0], [1], [0, 0, 1, 1], [], []>} : vector<8x64xf32>, vector<64x48xf32>, vector<8x48xf32> -> vector<8x48xf32>
    %186 = arith.addf %182, %185 : vector<8x48xf32>
    %c0_190 = arith.constant 0 : index
    %c0_191 = arith.constant 0 : index
    %c0_192 = arith.constant 0 : index
    %187 = vector.load %arg8[%c0_190, %c0_191, %c0_192] : memref<2x16x8xf32, #tpu.memory_space<vmem>>, vector<1x16x8xf32>
    %188 = vector.shape_cast %187 : vector<1x16x8xf32> to vector<16x8xf32>
    %cst_193 = arith.constant dense<0.000000e+00> : vector<16x48xf32>
    %189 = tpu.matmul %188, %171, %cst_193 {dimension_numbers = #tpu.dot_dimension_numbers<[1], [0], [0], [1], [0, 0, 1, 1], [], []>} : vector<16x8xf32>, vector<8x48xf32>, vector<16x48xf32> -> vector<16x48xf32>
    %c1_194 = arith.constant 1 : index
    %c0_195 = arith.constant 0 : index
    %c0_196 = arith.constant 0 : index
    %190 = vector.load %arg8[%c1_194, %c0_195, %c0_196] : memref<2x16x8xf32, #tpu.memory_space<vmem>>, vector<1x16x8xf32>
    %191 = vector.shape_cast %190 : vector<1x16x8xf32> to vector<16x8xf32>
    %cst_197 = arith.constant dense<0.000000e+00> : vector<16x48xf32>
    %192 = tpu.matmul %191, %186, %cst_197 {dimension_numbers = #tpu.dot_dimension_numbers<[1], [0], [0], [1], [0, 0, 1, 1], [], []>} : vector<16x8xf32>, vector<8x48xf32>, vector<16x48xf32> -> vector<16x48xf32>
    %193 = arith.addf %189, %192 : vector<16x48xf32>
    %c0_198 = arith.constant 0 : index
    %c0_199 = arith.constant 0 : index
    %194 = vector.load %arg26[%c0_198, %c0_199] : memref<1x48xf32, #tpu.memory_space<vmem>>, vector<1x48xf32>
    %195 = vector.broadcast %194 : vector<1x48xf32> to vector<16x48xf32>
    %196 = arith.addf %193, %195 : vector<16x48xf32>
    %cst_200 = arith.constant 0.000000e+00 : f32
    %197 = vector.broadcast %cst_200 : f32 to vector<16x48xf32>
    %198 = arith.maximumf %196, %197 : vector<16x48xf32>
    %c0_201 = arith.constant 0 : index
    %c0_202 = arith.constant 0 : index
    %c0_203 = arith.constant 0 : index
    %199 = vector.load %arg27[%c0_201, %c0_202, %c0_203] : memref<1x16x48xf32, #tpu.memory_space<vmem>>, vector<1x16x48xf32>
    %200 = vector.shape_cast %199 : vector<1x16x48xf32> to vector<16x48xf32>
    %201 = vector.shape_cast %198 : vector<16x48xf32> to vector<1x16x48xf32>
    tpu.vector_store %arg27[%c0_201, %c0_202, %c0_203], %201 {strides = array<i32>} : memref<1x16x48xf32, #tpu.memory_space<vmem>>, vector<1x16x48xf32>,
    return
  }
  func.func @transform_0(%arg0: i32) -> (i32, i32, i32) {
    %c0_i32 = arith.constant 0 : i32
    %c0_i32_0 = arith.constant 0 : i32
    %c0_i32_1 = arith.constant 0 : i32
    return %arg0, %c0_i32, %c0_i32_0 : i32, i32, i32
  }
  func.func @transform_1(%arg0: i32) -> (i32, i32, i32) {
    %c0_i32 = arith.constant 0 : i32
    %c0_i32_0 = arith.constant 0 : i32
    %c0_i32_1 = arith.constant 0 : i32
    %c0_i32_2 = arith.constant 0 : i32
    return %c0_i32, %c0_i32_0, %c0_i32_1 : i32, i32, i32
  }
  func.func @transform_2(%arg0: i32) -> (i32, i32, i32) {
    %c0_i32 = arith.constant 0 : i32
    %c0_i32_0 = arith.constant 0 : i32
    %c0_i32_1 = arith.constant 0 : i32
    %c0_i32_2 = arith.constant 0 : i32
    return %c0_i32, %c0_i32_0, %c0_i32_1 : i32, i32, i32
  }
  func.func @transform_3(%arg0: i32) -> (i32, i32, i32) {
    %c0_i32 = arith.constant 0 : i32
    %c0_i32_0 = arith.constant 0 : i32
    %c0_i32_1 = arith.constant 0 : i32
    %c0_i32_2 = arith.constant 0 : i32
    return %c0_i32, %c0_i32_0, %c0_i32_1 : i32, i32, i32
  }
  func.func @transform_4(%arg0: i32) -> (i32, i32) {
    %c0_i32 = arith.constant 0 : i32
    %c0_i32_0 = arith.constant 0 : i32
    %c0_i32_1 = arith.constant 0 : i32
    return %c0_i32, %c0_i32_0 : i32, i32
  }
  func.func @transform_5(%arg0: i32) -> (i32, i32) {
    %c0_i32 = arith.constant 0 : i32
    %c0_i32_0 = arith.constant 0 : i32
    %c0_i32_1 = arith.constant 0 : i32
    return %c0_i32, %c0_i32_0 : i32, i32
  }
  func.func @transform_6(%arg0: i32) -> (i32, i32, i32) {
    %c0_i32 = arith.constant 0 : i32
    %c0_i32_0 = arith.constant 0 : i32
    %c0_i32_1 = arith.constant 0 : i32
    %c0_i32_2 = arith.constant 0 : i32
    return %c0_i32, %c0_i32_0, %c0_i32_1 : i32, i32, i32
  }
  func.func @transform_7(%arg0: i32) -> (i32, i32, i32) {
    %c0_i32 = arith.constant 0 : i32
    %c0_i32_0 = arith.constant 0 : i32
    %c0_i32_1 = arith.constant 0 : i32
    %c0_i32_2 = arith.constant 0 : i32
    return %c0_i32, %c0_i32_0, %c0_i32_1 : i32, i32, i32
  }
  func.func @transform_8(%arg0: i32) -> (i32, i32, i32) {
    %c0_i32 = arith.constant 0 : i32
    %c0_i32_0 = arith.constant 0 : i32
    %c0_i32_1 = arith.constant 0 : i32
    %c0_i32_2 = arith.constant 0 : i32
    return %c0_i32, %c0_i32_0, %c0_i32_1 : i32, i32, i32
  }
  func.func @transform_9(%arg0: i32) -> (i32, i32) {
    %c0_i32 = arith.constant 0 : i32
    %c0_i32_0 = arith.constant 0 : i32
    %c0_i32_1 = arith.constant 0 : i32
    return %c0_i32, %c0_i32_0 : i32, i32
  }
  func.func @transform_10(%arg0: i32) -> (i32, i32, i32) {
    %c0_i32 = arith.constant 0 : i32
    %c0_i32_0 = arith.constant 0 : i32
    %c0_i32_1 = arith.constant 0 : i32
    %c0_i32_2 = arith.constant 0 : i32
    return %c0_i32, %c0_i32_0, %c0_i32_1 : i32, i32, i32
  }
  func.func @transform_11(%arg0: i32) -> (i32, i32) {
    %c0_i32 = arith.constant 0 : i32
    %c0_i32_0 = arith.constant 0 : i32
    %c0_i32_1 = arith.constant 0 : i32
    return %c0_i32, %c0_i32_0 : i32, i32
  }
  func.func @transform_12(%arg0: i32) -> (i32, i32) {
    %c0_i32 = arith.constant 0 : i32
    %c0_i32_0 = arith.constant 0 : i32
    %c0_i32_1 = arith.constant 0 : i32
    return %c0_i32, %c0_i32_0 : i32, i32
  }
  func.func @transform_13(%arg0: i32) -> (i32, i32) {
    %c0_i32 = arith.constant 0 : i32
    %c0_i32_0 = arith.constant 0 : i32
    %c0_i32_1 = arith.constant 0 : i32
    return %c0_i32, %c0_i32_0 : i32, i32
  }
  func.func @transform_14(%arg0: i32) -> (i32, i32, i32) {
    %c0_i32 = arith.constant 0 : i32
    %c0_i32_0 = arith.constant 0 : i32
    %c0_i32_1 = arith.constant 0 : i32
    %c0_i32_2 = arith.constant 0 : i32
    return %c0_i32, %c0_i32_0, %c0_i32_1 : i32, i32, i32
  }
  func.func @transform_15(%arg0: i32) -> (i32, i32) {
    %c0_i32 = arith.constant 0 : i32
    %c0_i32_0 = arith.constant 0 : i32
    %c0_i32_1 = arith.constant 0 : i32
    return %c0_i32, %c0_i32_0 : i32, i32
  }
  func.func @transform_16(%arg0: i32) -> (i32, i32) {
    %c0_i32 = arith.constant 0 : i32
    %c0_i32_0 = arith.constant 0 : i32
    %c0_i32_1 = arith.constant 0 : i32
    return %c0_i32, %c0_i32_0 : i32, i32
  }
  func.func @transform_17(%arg0: i32) -> (i32, i32) {
    %c0_i32 = arith.constant 0 : i32
    %c0_i32_0 = arith.constant 0 : i32
    %c0_i32_1 = arith.constant 0 : i32
    return %c0_i32, %c0_i32_0 : i32, i32
  }
  func.func @transform_18(%arg0: i32) -> (i32, i32, i32) {
    %c0_i32 = arith.constant 0 : i32
    %c0_i32_0 = arith.constant 0 : i32
    %c0_i32_1 = arith.constant 0 : i32
    %c0_i32_2 = arith.constant 0 : i32
    return %c0_i32, %c0_i32_0, %c0_i32_1 : i32, i32, i32
  }
  func.func @transform_19(%arg0: i32) -> (i32, i32) {
    %c0_i32 = arith.constant 0 : i32
    %c0_i32_0 = arith.constant 0 : i32
    %c0_i32_1 = arith.constant 0 : i32
    return %c0_i32, %c0_i32_0 : i32, i32
  }
  func.func @transform_20(%arg0: i32) -> (i32, i32, i32) {
    %c0_i32 = arith.constant 0 : i32
    %c0_i32_0 = arith.constant 0 : i32
    %c0_i32_1 = arith.constant 0 : i32
    %c0_i32_2 = arith.constant 0 : i32
    return %c0_i32, %c0_i32_0, %c0_i32_1 : i32, i32, i32
  }
  func.func @transform_21(%arg0: i32) -> (i32, i32, i32) {
    %c0_i32 = arith.constant 0 : i32
    %c0_i32_0 = arith.constant 0 : i32
    %c0_i32_1 = arith.constant 0 : i32
    %c0_i32_2 = arith.constant 0 : i32
    return %c0_i32, %c0_i32_0, %c0_i32_1 : i32, i32, i32
  }
  func.func @transform_22(%arg0: i32) -> (i32, i32) {
    %c0_i32 = arith.constant 0 : i32
    %c0_i32_0 = arith.constant 0 : i32
    %c0_i32_1 = arith.constant 0 : i32
    return %c0_i32, %c0_i32_0 : i32, i32
  }
  func.func @transform_23(%arg0: i32) -> (i32, i32, i32) {
    %c0_i32 = arith.constant 0 : i32
    %c0_i32_0 = arith.constant 0 : i32
    %c0_i32_1 = arith.constant 0 : i32
    %c0_i32_2 = arith.constant 0 : i32
    return %c0_i32, %c0_i32_0, %c0_i32_1 : i32, i32, i32
  }
  func.func @transform_24(%arg0: i32) -> (i32, i32, i32) {
    %c0_i32 = arith.constant 0 : i32
    %c0_i32_0 = arith.constant 0 : i32
    %c0_i32_1 = arith.constant 0 : i32
    %c0_i32_2 = arith.constant 0 : i32
    return %c0_i32, %c0_i32_0, %c0_i32_1 : i32, i32, i32
  }
  func.func @transform_25(%arg0: i32) -> (i32, i32) {
    %c0_i32 = arith.constant 0 : i32
    %c0_i32_0 = arith.constant 0 : i32
    %c0_i32_1 = arith.constant 0 : i32
    return %c0_i32, %c0_i32_0 : i32, i32
  }
  func.func @transform_26(%arg0: i32) -> (i32, i32, i32) {
    %c0_i32 = arith.constant 0 : i32
    %c0_i32_0 = arith.constant 0 : i32
    %c0_i32_1 = arith.constant 0 : i32
    return %arg0, %c0_i32, %c0_i32_0 : i32, i32, i32
  }
}

</mosaic_0001>

<bundles_post_ra>
// kernel: tile.98
= control target key start
LH: loop header
LB: loop body
LE: loop exit
PB: predicated region body
PF: predicated region fallthrough
CT: control target
= control target key end

     0   :  { %s28_s0 = inlined_call_operand.vmem [shape: f32[3], index: 0, kind: input, shape index: {}]   ;;  %s29_s1 = inlined_call_operand.vmem [shape: f32[16,3], index: 1, kind: output, shape index: {}]  }
   0x1   :  { %v4_v0 = vld [vmem:[%s28_s0] ss:$0 sm:$0xff] }
   0x2   :  { %5 = vst [vmem:[%s29_s1] sm:$0xff] %v4_v0  ;;  %8 = vst [vmem:[%s29_s1 + $0x8] sm:$0xff] %v4_v0 }

// kernel: tile.99
= control target key start
LH: loop header
LB: loop body
LE: loop exit
PB: predicated region body
PF: predicated region fallthrough
CT: control target
= control target key end

     0   :  { %s131_s10 = smov 45   ;;  %s132_s11 = smov 39   ;;  %vm3_vm0 = vcmask 23552   ;;  %vm9_vm1 = vcmask 392552   ;;  %vm15_vm2 = vcmask 367952   ;;  %vm21_vm3 = vcmask 343352   ;;  %s207_s0 = inlined_call_operand.vmem [shape: f32[16,3], index: 0, kind: input, shape index: {}]   ;;  %s208_s1 = inlined_call_operand.vmem [shape: f32[1,48], index: 1, kind: output, shape index: {}]  }
   0x1   :  { %v101_v0 = vld [vmem:[%s207_s0 + $0xf] sm:$0x1]   ;;  %v103_v1 = vld [vmem:[%s207_s0 + $0xd] sm:$0x1]   ;;  %v102_v2 = vld [vmem:[%s207_s0 + $0xe] sm:$0x1]  }
   0x2   :  { %7 = vrot.lane.b32.xlu0 %v101_v0, %s131_s10  ;;  %19 = vrot.lane.b32.xlu1 %v103_v1, %s132_s11  ;;  %v104_v3 = vld [vmem:[%s207_s0 + $0xc] sm:$0x1]   ;;  %s133_s16 = smov 42   ;;  %s134_s17 = smov 36   ;;  %v105_v4 = vld [vmem:[%s207_s0 + $0xb] sm:$0x1]  }
   0x3   :  { %v106_v5 = vld [vmem:[%s207_s0 + $0xa] sm:$0x1]   ;;  %v2_v6 = vld [vmem:[%s207_s0] sm:$0x1]   ;;  %s135_s24 = smov 33   ;;  %s136_s25 = smov 30  }
   0x4   :  { %4 = vst.msk [vmem:[#allocation0] sm:$0x1] %vm3_vm0, %v2_v6   ;;  %v107_v7 = vld [vmem:[%s207_s0 + $0x9] sm:$0x1]   ;;  %v108_v8 = vld [vmem:[%s207_s0 + $0x8] sm:$0x1]  }
   0x5   :  { %s137_s30 = smov 27   ;;  %s138_s2 = smov 24   ;;  %v109_v9 = vld [vmem:[%s207_s0 + $0x7] sm:$0x1]   ;;  %v110_v10 = vld [vmem:[%s207_s0 + $0x6] sm:$0x1]  }
   0x6   :  { %13 = vrot.lane.b32.xlu0 %v102_v2, %s133_s16  ;;  %25 = vrot.lane.b32.xlu1 %v104_v3, %s134_s17  ;;  %s139_s7 = smov 21   ;;  %s140_s8 = smov 18   ;;  %v111_v11 = vld [vmem:[%s207_s0 + $0x5] sm:$0x1]   ;;  %v112_v12 = vld [vmem:[%s207_s0 + $0x4] sm:$0x1]  }
   0x7   :  { %s141_s13 = smov 15   ;;  %s142_s14 = smov 12   ;;  %v113_v13 = vld [vmem:[%s207_s0 + $0x3] sm:$0x1]   ;;  %v114_v14 = vld [vmem:[%s207_s0 + $0x2] sm:$0x1]  }
   0x8   :  { %s143_s19 = smov 9   ;;  %s144_s20 = smov 6   ;;  %v115_v15 = vld [vmem:[%s207_s0 + $0x1] sm:$0x1]   ;;  %vm27_vm4 = vcmask 318752   ;;  %vm33_vm5 = vcmask 294152  }
   0x9   :  { %s145_s0 = smov 3   ;;  %vm39_vm6 = vcmask 269552   ;;  %vm45_vm7 = vcmask 244952   ;;  %vm51_vm8 = vcmask 220352   ;;  %vm57_vm9 = vcmask 195752  }
   0xa   :  { %31 = vrot.lane.b32.xlu0 %v105_v4, %s135_s24  ;;  %37 = vrot.lane.b32.xlu1 %v106_v5, %s136_s25  ;;  %vm63_vm10 = vcmask 171152   ;;  %vm69_vm11 = vcmask 146552   ;;  %vm75_vm12 = vcmask 121952   ;;  %vm81_vm13 = vcmask 97352  }
   0xb   :  { %vm87_vm14 = vcmask 72752   ;;  %vm93_vm15 = vcmask 48152  }
   0xe   :  { %43 = vrot.lane.b32.xlu0 %v107_v7, %s137_s30  ;;  %49 = vrot.lane.b32.xlu1 %v108_v8, %s138_s2 }
  0x12   :  { %55 = vrot.lane.b32.xlu0 %v109_v9, %s139_s7  ;;  %61 = vrot.lane.b32.xlu1 %v110_v10, %s140_s8 }
  0x16   :  { %67 = vrot.lane.b32.xlu0 %v111_v11, %s141_s13  ;;  %73 = vrot.lane.b32.xlu1 %v112_v12, %s142_s14 }
  0x1a   :  { %79 = vrot.lane.b32.xlu0 %v113_v13, %s143_s19  ;;  %85 = vrot.lane.b32.xlu1 %v114_v14, %s144_s20 }
  0x1e   :  { %91 = vrot.lane.b32.xlu0 %v115_v15, %s145_s0 }
  0x74   :  { %v8_v16 = vpop.permute.xlu0 %7   ;;  %v20_v17 = vpop.permute.xlu1 %19  }
  0x75   :  { %10 = vst.msk [vmem:[#allocation0] sm:$0x1] %vm9_vm1, %v8_v16  }
  0x78   :  { %v14_v18 = vpop.permute.xlu0 %13   ;;  %v26_v19 = vpop.permute.xlu1 %25  }
  0x79   :  { %16 = vst.msk [vmem:[#allocation0] sm:$0x1] %vm15_vm2, %v14_v18  }
  0x7a   :  { %22 = vst.msk [vmem:[#allocation0] sm:$0x1] %vm21_vm3, %v20_v17  }
  0x7b   :  { %28 = vst.msk [vmem:[#allocation0] sm:$0x1] %vm27_vm4, %v26_v19  }
  0x7c   :  { %v32_v20 = vpop.permute.xlu0 %31   ;;  %v38_v21 = vpop.permute.xlu1 %37  }
  0x7d   :  { %34 = vst.msk [vmem:[#allocation0] sm:$0x1] %vm33_vm5, %v32_v20  }
  0x7e   :  { %40 = vst.msk [vmem:[#allocation0] sm:$0x1] %vm39_vm6, %v38_v21  }
  0x80   :  { %v44_v22 = vpop.permute.xlu0 %43   ;;  %v50_v23 = vpop.permute.xlu1 %49  }
  0x81   :  { %46 = vst.msk [vmem:[#allocation0] sm:$0x1] %vm45_vm7, %v44_v22  }
  0x82   :  { %52 = vst.msk [vmem:[#allocation0] sm:$0x1] %vm51_vm8, %v50_v23  }
  0x84   :  { %v56_v24 = vpop.permute.xlu0 %55   ;;  %v62_v25 = vpop.permute.xlu1 %61  }
  0x85   :  { %58 = vst.msk [vmem:[#allocation0] sm:$0x1] %vm57_vm9, %v56_v24  }
  0x86   :  { %64 = vst.msk [vmem:[#allocation0] sm:$0x1] %vm63_vm10, %v62_v25  }
  0x88   :  { %v68_v26 = vpop.permute.xlu0 %67   ;;  %v74_v27 = vpop.permute.xlu1 %73  }
  0x89   :  { %70 = vst.msk [vmem:[#allocation0] sm:$0x1] %vm69_vm11, %v68_v26  }
  0x8a   :  { %76 = vst.msk [vmem:[#allocation0] sm:$0x1] %vm75_vm12, %v74_v27  }
  0x8c   :  { %v80_v28 = vpop.permute.xlu0 %79   ;;  %v86_v29 = vpop.permute.xlu1 %85  }
  0x8d   :  { %82 = vst.msk [vmem:[#allocation0] sm:$0x1] %vm81_vm13, %v80_v28  }
  0x8e   :  { %88 = vst.msk [vmem:[#allocation0] sm:$0x1] %vm87_vm14, %v86_v29  }
  0x90   :  { %v92_v30 = vpop.permute.xlu0 %91  }
  0x91   :  { %94 = vst.msk [vmem:[#allocation0] sm:$0x1] %vm93_vm15, %v92_v30  }
  0x98   :  { %v98_v31 = vld [vmem:[#allocation0] sm:$0x1] }
  0x99   :  { %100 = vst [vmem:[%s208_s1] sm:$0x1] %v98_v31 }

// kernel: tile.53
= control target key start
LH: loop header
LB: loop body
LE: loop exit
PB: predicated region body
PF: predicated region fallthrough
CT: control target
= control target key end

     0   :  { %s22_s0 = inlined_call_operand.vmem [shape: f32[8], index: 0, kind: input, shape index: {}]   ;;  %s23_s1 = inlined_call_operand.vmem [shape: f32[8,8], index: 1, kind: output, shape index: {}]  }
   0x1   :  { %v4_v0 = vld [vmem:[%s22_s0] ss:$0 sm:$0xff] }
   0x2   :  { %5 = vst [vmem:[%s23_s1] sm:$0xff] %v4_v0 }

// kernel: tile.54
= control target key start
LH: loop header
LB: loop body
LE: loop exit
PB: predicated region body
PF: predicated region fallthrough
CT: control target
= control target key end

     0   :  { %s67_s10 = smov 56   ;;  %s68_s11 = smov 40   ;;  %vm3_vm0 = vcmask 64512   ;;  %vm9_vm1 = vcmask 523712   ;;  %vm15_vm2 = vcmask 458112   ;;  %vm21_vm3 = vcmask 392512   ;;  %s111_s0 = inlined_call_operand.vmem [shape: f32[8,8], index: 0, kind: input, shape index: {}]   ;;  %s112_s1 = inlined_call_operand.vmem [shape: f32[1,64], index: 1, kind: output, shape index: {}]  }
   0x1   :  { %v53_v0 = vld [vmem:[%s111_s0 + $0x7] sm:$0x1]   ;;  %v55_v1 = vld [vmem:[%s111_s0 + $0x5] sm:$0x1]   ;;  %v54_v2 = vld [vmem:[%s111_s0 + $0x6] sm:$0x1]  }
   0x2   :  { %7 = vrot.lane.b32.xlu0 %v53_v0, %s67_s10  ;;  %19 = vrot.lane.b32.xlu1 %v55_v1, %s68_s11  ;;  %v56_v3 = vld [vmem:[%s111_s0 + $0x4] sm:$0x1]   ;;  %v2_v4 = vld [vmem:[%s111_s0] sm:$0x1]   ;;  %s69_s18 = smov 48   ;;  %s70_s19 = smov 32  }
   0x3   :  { %4 = vst.msk [vmem:[#allocation0] sm:$0x1] %vm3_vm0, %v2_v4   ;;  %v57_v5 = vld [vmem:[%s111_s0 + $0x3] sm:$0x1]   ;;  %v58_v6 = vld [vmem:[%s111_s0 + $0x2] sm:$0x1]  }
   0x4   :  { %s71_s24 = smov 24   ;;  %s72_s25 = smov 16   ;;  %v59_v7 = vld [vmem:[%s111_s0 + $0x1] sm:$0x1]   ;;  %vm27_vm4 = vcmask 326912   ;;  %vm33_vm5 = vcmask 261312  }
   0x5   :  { %s73_s0 = smov 8   ;;  %vm39_vm6 = vcmask 195712   ;;  %vm45_vm7 = vcmask 130112  }
   0x6   :  { %13 = vrot.lane.b32.xlu0 %v54_v2, %s69_s18  ;;  %25 = vrot.lane.b32.xlu1 %v56_v3, %s70_s19 }
   0xa   :  { %31 = vrot.lane.b32.xlu0 %v57_v5, %s71_s24  ;;  %37 = vrot.lane.b32.xlu1 %v58_v6, %s72_s25 }
   0xe   :  { %43 = vrot.lane.b32.xlu0 %v59_v7, %s73_s0 }
  0x74   :  { %v8_v8 = vpop.permute.xlu0 %7   ;;  %v20_v9 = vpop.permute.xlu1 %19  }
  0x75   :  { %10 = vst.msk [vmem:[#allocation0] sm:$0x1] %vm9_vm1, %v8_v8  }
  0x78   :  { %v14_v10 = vpop.permute.xlu0 %13   ;;  %v26_v11 = vpop.permute.xlu1 %25  }
  0x79   :  { %16 = vst.msk [vmem:[#allocation0] sm:$0x1] %vm15_vm2, %v14_v10  }
  0x7a   :  { %22 = vst.msk [vmem:[#allocation0] sm:$0x1] %vm21_vm3, %v20_v9  }
  0x7b   :  { %28 = vst.msk [vmem:[#allocation0] sm:$0x1] %vm27_vm4, %v26_v11  }
  0x7c   :  { %v32_v12 = vpop.permute.xlu0 %31   ;;  %v38_v13 = vpop.permute.xlu1 %37  }
  0x7d   :  { %34 = vst.msk [vmem:[#allocation0] sm:$0x1] %vm33_vm5, %v32_v12  }
  0x7e   :  { %40 = vst.msk [vmem:[#allocation0] sm:$0x1] %vm39_vm6, %v38_v13  }
  0x80   :  { %v44_v14 = vpop.permute.xlu0 %43  }
  0x81   :  { %46 = vst.msk [vmem:[#allocation0] sm:$0x1] %vm45_vm7, %v44_v14  }
  0x88   :  { %v50_v15 = vld [vmem:[#allocation0] sm:$0x1] }
  0x89   :  { %52 = vst [vmem:[%s112_s1] sm:$0x1] %v50_v15 }

// kernel: tile.58
= control target key start
LH: loop header
LB: loop body
LE: loop exit
PB: predicated region body
PF: predicated region fallthrough
CT: control target
= control target key end

     0   :  { %s22_s0 = inlined_call_operand.vmem [shape: f32[16], index: 0, kind: input, shape index: {}]   ;;  %s23_s1 = inlined_call_operand.vmem [shape: f32[4,16], index: 1, kind: output, shape index: {}]  }
   0x1   :  { %v4_v0 = vld [vmem:[%s22_s0] ss:$0 sm:$0xff] }
   0x2   :  { %5 = vst [vmem:[%s23_s1] sm:$0xf] %v4_v0 }

// kernel: tile.59
= control target key start
LH: loop header
LB: loop body
LE: loop exit
PB: predicated region body
PF: predicated region fallthrough
CT: control target
= control target key end

     0   :  { %vm7_vm0 = vcmask 130048   ;;  %s37_s8 = smov 16   ;;  %s38_s9 = smov 32   ;;  %vm13_vm1 = vcmask 523648   ;;  %vm19_vm2 = vcmask 392448   ;;  %vm25_vm3 = vcmask 261248   ;;  %s55_s0 = inlined_call_operand.vmem [shape: f32[4,16], index: 0, kind: input, shape index: {}]   ;;  %s56_s1 = inlined_call_operand.vmem [shape: f32[1,64], index: 1, kind: output, shape index: {}]  }
   0x1   :  { %v4_v0 = vld [vmem:[%s55_s0] sm:$0xf]  ;;  %s36_s0 = smov 48  }
   0x2   :  { %5 = vst [vmem:[#allocation1] sm:$0xf] %v4_v0 }
   0x9   :  { %v10_v1 = vld [vmem:[#allocation1 + $0x3] sm:$0x1]   ;;  %v22_v2 = vld [vmem:[#allocation1 + $0x1] sm:$0x1]   ;;  %v6_v3 = vld [vmem:[#allocation1] sm:$0x1]  }
   0xa   :  { %11 = vrot.lane.b32.xlu0 %v10_v1, %s36_s0  ;;  %23 = vrot.lane.b32.xlu1 %v22_v2, %s37_s8  ;;  %v16_v4 = vld [vmem:[#allocation1 + $0x2] sm:$0x1]   ;;  %8 = vst.msk [vmem:[#allocation0] sm:$0x1] %vm7_vm0, %v6_v3  }
   0xe   :  { %17 = vrot.lane.b32.xlu0 %v16_v4, %s38_s9 }
  0x7c   :  { %v12_v5 = vpop.permute.xlu0 %11   ;;  %v24_v6 = vpop.permute.xlu1 %23  }
  0x7d   :  { %14 = vst.msk [vmem:[#allocation0] sm:$0x1] %vm13_vm1, %v12_v5  }
  0x80   :  { %v18_v7 = vpop.permute.xlu0 %17  }
  0x81   :  { %20 = vst.msk [vmem:[#allocation0] sm:$0x1] %vm19_vm2, %v18_v7  }
  0x82   :  { %26 = vst.msk [vmem:[#allocation0] sm:$0x1] %vm25_vm3, %v24_v6  }
  0x89   :  { %v30_v8 = vld [vmem:[#allocation0] sm:$0x1] }
  0x8a   :  { %32 = vst [vmem:[%s56_s1] sm:$0x1] %v30_v8 }

// kernel: segresnet_forward.1
= control target key start
LH: loop header
LB: loop body
LE: loop exit
PB: predicated region body
PF: predicated region fallthrough
CT: control target
= control target key end

     0   :  { %s5915_s27 = smov 0   ;;  %s6887_s0 = inlined_call_operand.vmem [shape: f32[2,16,64], index: 0, kind: input, shape index: {}]   ;;  %s6888_s1 = inlined_call_operand.vmem [shape: f32[3,8,16], index: 1, kind: input, shape index: {}]   ;;  %s6889_s2 = inlined_call_operand.vmem [shape: f32[3,4,8], index: 2, kind: input, shape index: {}]   ;;  %s6890_s3 = inlined_call_operand.vmem [shape: f32[3,4,4], index: 3, kind: input, shape index: {}]   ;;  %s6891_s4 = inlined_call_operand.vmem [shape: f32[4,4], index: 4, kind: input, shape index: {}]   ;;  %s6892_s5 = inlined_call_operand.vmem [shape: f32[8,8], index: 5, kind: input, shape index: {}]   ;;  %s6893_s6 = inlined_call_operand.vmem [shape: f32[2,8,4], index: 6, kind: input, shape index: {}]   ;;  %s6894_s7 = inlined_call_operand.vmem [shape: f32[2,16,8], index: 7, kind: input, shape index: {}]   ;;  %s6895_s8 = inlined_call_operand.vmem [shape: f32[3,64,64], index: 8, kind: input, shape index: {}]   ;;  %s6896_s9 = inlined_call_operand.vmem [shape: f32[1,64], index: 9, kind: input, shape index: {}]   ;;  %s6897_s10 = inlined_call_operand.vmem [shape: f32[3,64,64], index: 10, kind: input, shape index: {}]   ;;  %s6898_s11 = inlined_call_operand.vmem [shape: f32[1,64], index: 11, kind: input, shape index: {}]   ;;  %s6899_s12 = inlined_call_operand.vmem [shape: f32[1,64], index: 12, kind: input, shape index: {}]   ;;  %s6900_s13 = inlined_call_operand.vmem [shape: f32[1,64], index: 13, kind: input, shape index: {}]   ;;  %s6901_s14 = inlined_call_operand.vmem [shape: f32[3,64,64], index: 14, kind: input, shape index: {}]   ;;  %s6902_s15 = inlined_call_operand.vmem [shape: f32[1,64], index: 15, kind: input, shape index: {}]   ;;  %s6903_s16 = inlined_call_operand.vmem [shape: f32[1,64], index: 16, kind: input, shape index: {}]   ;;  %s6904_s17 = inlined_call_operand.vmem [shape: f32[1,64], index: 17, kind: input, shape index: {}]   ;;  %s6905_s18 = inlined_call_operand.vmem [shape: f32[3,64,64], index: 18, kind: input, shape index: {}]   ;;  %s6906_s19 = inlined_call_operand.vmem [shape: f32[1,64], index: 19, kind: input, shape index: {}]   ;;  %s6907_s20 = inlined_call_operand.vmem [shape: f32[3,64,64], index: 20, kind: input, shape index: {}]   ;;  %s6908_s21 = inlined_call_operand.vmem [shape: f32[3,64,64], index: 21, kind: input, shape index: {}]   ;;  %s6909_s22 = inlined_call_operand.vmem [shape: f32[1,64], index: 22, kind: input, shape index: {}]   ;;  %s6910_s23 = inlined_call_operand.vmem [shape: f32[3,64,48], index: 23, kind: input, shape index: {}]   ;;  %s6911_s24 = inlined_call_operand.vmem [shape: f32[3,64,48], index: 24, kind: input, shape index: {}]   ;;  %s6912_s25 = inlined_call_operand.vmem [shape: f32[1,48], index: 25, kind: input, shape index: {}]   ;;  %s6913_s26 = inlined_call_operand.vmem [shape: f32[2,16,48], index: 26, kind: output, shape index: {}]  }
   0x1   :  { %6925 = sst [smem:[#allocation2_spill]] %s6887_s0 }
   0x2   :  { %6926 = sst [smem:[#allocation3_spill]] %s6888_s1 }
   0x3   :  { %6927 = sst [smem:[#allocation4_spill]] %s6889_s2 }
   0x4   :  { %6928 = sst [smem:[#allocation5_spill]] %s6890_s3 }
   0x5   :  { %6929 = sst [smem:[#allocation6_spill]] %s6891_s4 }
   0x6   :  { %6930 = sst [smem:[#allocation7_spill]] %s6892_s5 }
   0x7   :  { %6931 = sst [smem:[#allocation8_spill]] %s6893_s6 }
   0x8   :  { %6932 = sst [smem:[#allocation9_spill]] %s6894_s7 }
   0x9   :  { %6933 = sst [smem:[#allocation10_spill]] %s6895_s8 }
   0xa   :  { %6934 = sst [smem:[#allocation11_spill]] %s6896_s9 }
   0xb   :  { %6935 = sst [smem:[#allocation12_spill]] %s6897_s10 }
   0xc   :  { %6936 = sst [smem:[#allocation13_spill]] %s6898_s11 }
   0xd LB: > { %s4404_s3 = sadd.s32 4294967295, %s5775_s27   ;;  %p4408_p0 = scmp.ge.s32.totalorder %s5775_s27, 1  ;;  %s5775_s27 = sphi %s5915_s27, %s36_s27  }
   0xe   : > { %p712_p1 = scmp.lt.s32.totalorder %s5775_s27, 3 }
  0x10   : > { %p713_p2 = pnand %p4408_p0, %p712_p1 }
  0x11   : > { %p782_p3 = scmp.lt.s32.totalorder (!%p713_p2), %s4404_s3, 1  ;;  %v5777_v0 = vmov (!%p713_p2), 0.0|0.0   ;;  %vm5778_vm0 = vmmov (!%p713_p2), 0   ;;  %v5779_v1 = vmov (!%p713_p2), 0.0   ;;  %s6937_s4 = sld [smem:[#allocation2_spill]] (!%p713_p2)  ;;  %vm795_vm1 = vcmask (!%p713_p2), 130048  }
  0x12   : > { %716 = sbr.rel (%p713_p2) target bundleno = 3996 (0xf9c), region = 124  ;;  %5443 = vmatprep.subr.bf16.mxu1 (!%p713_p2), %v5777_v0  ;;  %4885 = vmatprep.mubr.msk.f32.mxu1 (!%p713_p2), %vm5778_vm0, %v5779_v1  ;;  %s6938_s30 = sld [smem:[#allocation3_spill]] (!%p713_p2)  ;;  %vm961_vm2 = vcmask (!%p713_p2), 523264   ;;  %vm1276_vm3 = vcmask (!%p713_p2), 64512   ;;  %vm1777_vm4 = vcmask (!%p713_p2), 1043456   ;;  %vm1773_vm5 = vcmask (!%p713_p2), 31744  }
  0x13   : > { %4959 = vmatprep.subr.mxu0 (!%p713_p2), %v5779_v1  ;;  %4961 = vmatprep.mubr.msk.f32.mxu0 (!%p713_p2), %vm5778_vm0, %v5779_v1  ;;  %s6939_s10 = sld [smem:[#allocation10_spill]] (!%p713_p2)  ;;  %s6940_s28 = sld [smem:[#allocation12_spill]] (!%p713_p2)  ;;  %vm4346_vm6 = vcmask (!%p713_p2), 392192  }
  0x14   : > { %s6941_s6 = sld [smem:[#allocation11_spill]] (!%p713_p2)  ;;  %s6943_s11 = sld [smem:[#allocation13_spill]] (!%p713_p2) }
  0x18   : > { %v794_v5 = vld [vmem:[%s6938_s30] sm:$0xff] (!%p713_p2)  ;;  %v4414_v8 = vld [vmem:[%s6938_s30 + $0x8] sm:$0xff] (!%p713_p2)  ;;  %v4426_v35 = vld [vmem:[%s6938_s30 + $0x10] sm:$0xff] (!%p713_p2) }
  0x19   : > { %s6951_s3 = smov (!%p782_p3, %s4404_s3), 1  ;;  %v4416_v6 = vld [vmem:[%s6939_s10 + $0x40] sm:$0xff]  ;;  %v4417_v7 = vld [vmem:[%s6939_s10 + $0x48] sm:$0xff]  ;;  %v4418_v10 = vld [vmem:[%s6939_s10 + $0x50] sm:$0xff] }
  0x1a   : > { %s6921_s7 = sshll.u32 %s6951_s3, 4  ;;  %v5450_v9 = vpack.c.bf16 %v4417_v7, %v4416_v6  ;;  %v4419_v11 = vld [vmem:[%s6939_s10 + $0x58] sm:$0xff]  ;;  %v4420_v13 = vld [vmem:[%s6939_s10 + $0x60] sm:$0xff]  ;;  %v4421_v14 = vld [vmem:[%s6939_s10 + $0x68] sm:$0xff]  ;;  %s6949_s1 = sshll.u32 %s6951_s3, 4 }
  0x1b   : > { %s786_s29 = scalar_lea.vmem %s6937_s4, %s6921_s7  ;;  %v5453_v12 = vpack.c.bf16 %v4419_v11, %v4418_v10  ;;  %v5456_v15 = vpack.c.bf16 %v4421_v14, %v4420_v13  ;;  %v4422_v16 = vld [vmem:[%s6939_s10 + $0x70] sm:$0xff]  ;;  %v4423_v17 = vld [vmem:[%s6939_s10 + $0x78] sm:$0xff]  ;;  %v869_v19 = vld [vmem:[%s6939_s10] sm:$0xff]  ;;  %s6942_s4 = sld [smem:[#allocation4_spill]] }
  0x1c   : > { %v792_v2 = vld [vmem:[%s786_s29] sm:$0xff]  ;;  %v793_v3 = vld [vmem:[%s786_s29 + $0x8] sm:$0xff]  ;;  %v5459_v18 = vpack.c.bf16 %v4423_v17, %v4422_v16  ;;  %v871_v24 = vld [vmem:[%s6939_s10 + $0x10] sm:$0xff]  ;;  %s6944_s7 = sld [smem:[#allocation5_spill]]  ;;  %s6946_s29 = sld [smem:[#allocation8_spill]] }
  0x1d   : > { %v5444_v4 = vpack.c.bf16 %v793_v3, %v792_v2  ;;  %v870_v20 = vld [vmem:[%s6939_s10 + $0x8] sm:$0xff]  ;;  %v872_v25 = vld [vmem:[%s6939_s10 + $0x18] sm:$0xff]  ;;  %v873_v29 = vld [vmem:[%s6939_s10 + $0x20] sm:$0xff]  ;;  %s791_s0 = scalar_lea.vmem %s6913_s26, %s6949_s1 }
  0x1e   : > { %v5462_v23 = vpack.c.bf16 %v870_v20, %v869_v19  ;;  %v5465_v28 = vpack.c.bf16 %v872_v25, %v871_v24  ;;  %v874_v30 = vld [vmem:[%s6939_s10 + $0x28] sm:$0xff]  ;;  %v875_v32 = vld [vmem:[%s6939_s10 + $0x30] sm:$0xff]  ;;  %v876_v33 = vld [vmem:[%s6939_s10 + $0x38] sm:$0xff] }
  0x1f   : > { %5445 = vmatpush3.bf16.msra.mxu1 %v5444_v4  ;;  %v5468_v31 = vpack.c.bf16 %v874_v30, %v873_v29  ;;  %v5471_v34 = vpack.c.bf16 %v876_v33, %v875_v32  ;;  %v4428_v36 = vld [vmem:[%s6939_s10 + $0x80] sm:$0xff]  ;;  %v4429_v37 = vld [vmem:[%s6939_s10 + $0x88] sm:$0xff]  ;;  %v4430_v38 = vld [vmem:[%s6939_s10 + $0x90] sm:$0xff] }
  0x20   : > { %5446 = vmatprep.subr.bf16.mxu1 %v5777_v0  ;;  %v5477_v39 = vpack.c.bf16 %v4429_v37, %v4428_v36  ;;  %v4431_v40 = vld [vmem:[%s6939_s10 + $0x98] sm:$0xff]  ;;  %v4432_v42 = vld [vmem:[%s6939_s10 + $0xa0] sm:$0xff]  ;;  %v4433_v43 = vld [vmem:[%s6939_s10 + $0xa8] sm:$0xff] }
  0x21   : > { %v5480_v41 = vpack.c.bf16 %v4431_v40, %v4430_v38  ;;  %v5483_v44 = vpack.c.bf16 %v4433_v43, %v4432_v42  ;;  %v4434_v45 = vld [vmem:[%s6939_s10 + $0xb0] sm:$0xff]  ;;  %v4435_v46 = vld [vmem:[%s6939_s10 + $0xb8] sm:$0xff]  ;;  %v1350_v55 = vld [vmem:[%s6940_s28] sm:$0xff]  ;;  %s6947_s10 = sld [smem:[#allocation7_spill]] }
  0x22   : > { %4886 = vmatmul.mubr.msk.f32.vlgmr.msra.gmra.mrb[0].mxu1 %vm795_vm1, %v794_v5  ;;  %v5486_v47 = vpack.c.bf16 %v4435_v46, %v4434_v45  ;;  %v1351_v56 = vld [vmem:[%s6940_s28 + $0x8] sm:$0xff]  ;;  %v1352_v58 = vld [vmem:[%s6940_s28 + $0x10] sm:$0xff]  ;;  %v1353_v59 = vld [vmem:[%s6940_s28 + $0x18] sm:$0xff] }
  0x23   : > { %5448 = vmatpush3.bf16.msra.mxu1 %v5444_v4  ;;  %4892 = vmatprep.mubr.msk.f32.mxu1 %vm5778_vm0, %v5779_v1  ;;  %v5501_v57 = vpack.c.bf16 %v1351_v56, %v1350_v55  ;;  %v5504_v60 = vpack.c.bf16 %v1353_v59, %v1352_v58  ;;  %v1354_v61 = vld [vmem:[%s6940_s28 + $0x20] sm:$0xff]  ;;  %v1355_v62 = vld [vmem:[%s6940_s28 + $0x28] sm:$0xff]  ;;  %v1356_v2 = vld [vmem:[%s6940_s28 + $0x30] sm:$0xff] }
  0x24   : > { %5449 = vmatprep.subr.bf16.mxu1 %v5777_v0  ;;  %v5507_v63 = vpack.c.bf16 %v1355_v62, %v1354_v61  ;;  %v1357_v3 = vld [vmem:[%s6940_s28 + $0x38] sm:$0xff]  ;;  %v4437_v6 = vld [vmem:[%s6941_s6] ss:$0 sm:$0xff]  ;;  %v4442_v13 = vld [vmem:[%s6940_s28 + $0x48] sm:$0xff]  ;;  %s6945_s6 = sld [smem:[#allocation6_spill]] }
  0x25   : > { %v1275_v11 = vld [vmem:[%s6942_s4] sm:$0xf]  ;;  %v4439_v14 = vld [vmem:[%s6942_s4 + $0x4] sm:$0xf]  ;;  %v4443_v16 = vld [vmem:[%s6940_s28 + $0x50] sm:$0xff] }
  0x26   : > { %4893 = vmatmul.mubr.msk.f32.vlgmr.msra.gmra.mrb[2].mxu1 %vm795_vm1, %v4414_v8  ;;  %v4444_v17 = vld [vmem:[%s6940_s28 + $0x58] sm:$0xff]  ;;  %v4445_v19 = vld [vmem:[%s6940_s28 + $0x60] sm:$0xff]  ;;  %v4446_v20 = vld [vmem:[%s6940_s28 + $0x68] sm:$0xff] }
  0x27   : > { %5451 = vmatpush3.bf16.msra.mxu1 %v5450_v9  ;;  %4911 = vmatprep.mubr.msk.f32.mxu1 %vm5778_vm0, %v5779_v1  ;;  %v4455_v33 = vld [vmem:[%s6940_s28 + $0x90] sm:$0xff]  ;;  %v4457_v36 = vld [vmem:[%s6940_s28 + $0xa0] sm:$0xff]  ;;  %v4458_v37 = vld [vmem:[%s6940_s28 + $0xa8] sm:$0xff] }
  0x28   : > { %5452 = vmatprep.subr.bf16.mxu1 %v5777_v0  ;;  %v5519_v38 = vpack.c.bf16 %v4458_v37, %v4457_v36  ;;  %v4460_v40 = vld [vmem:[%s6940_s28 + $0xb8] sm:$0xff]  ;;  %v1855_v55 = vld [vmem:[%s6901_s14 + $0x20] sm:$0xff]  ;;  %v1856_v56 = vld [vmem:[%s6901_s14 + $0x28] sm:$0xff] }
  0x29   : > { %v1857_v58 = vld [vmem:[%s6901_s14 + $0x30] sm:$0xff]  ;;  %v1858_v59 = vld [vmem:[%s6901_s14 + $0x38] sm:$0xff]  ;;  %v4462_v62 = vld [vmem:[%s6943_s11] ss:$0 sm:$0xff] }
  0x2a   : > { %v4487_v36 = vld [vmem:[%s6901_s14 + $0xa0] sm:$0xff]  ;;  %v4488_v37 = vld [vmem:[%s6901_s14 + $0xa8] sm:$0xff] }
  0x2b   : > { %5454 = vmatpush3.bf16.msra.mxu1 %v5453_v12  ;;  %v4441_v12 = vld [vmem:[%s6940_s28 + $0x40] sm:$0xff] }
  0x2c   : > { %5455 = vmatprep.subr.bf16.mxu1 %v5777_v0 }
  0x2f   : > { %5457 = vmatpush3.bf16.msra.mxu1 %v5456_v15  ;;  %v5489_v15 = vpack.c.bf16 %v4442_v13, %v4441_v12  ;;  %v4470_v12 = vld [vmem:[%s6901_s14 + $0x40] sm:$0xff]  ;;  %v4471_v13 = vld [vmem:[%s6901_s14 + $0x48] sm:$0xff] }
  0x30   : > { %5458 = vmatprep.subr.bf16.mxu1 %v5777_v0 }
  0x33   : > { %5460 = vmatpush3.bf16.msra.mxu1 %v5459_v18  ;;  %v5492_v18 = vpack.c.bf16 %v4444_v17, %v4443_v16  ;;  %v4472_v16 = vld [vmem:[%s6901_s14 + $0x50] sm:$0xff]  ;;  %v4473_v17 = vld [vmem:[%s6901_s14 + $0x58] sm:$0xff] }
  0x34   : > { %5461 = vmatprep.subr.bf16.mxu1 %v5777_v0 }
  0xf5   : > { %v865_v21 = vpop.f32.mrb[0].mxu1 }
  0xf6   : > { %v4887_v22 = vpop.f32.mrb[1].mxu1 }
  0xf7   : > { %v4447_v22 = vld [vmem:[%s6940_s28 + $0x70] sm:$0xff] }
  0xf9   : > { %v948_v26 = vpop.f32.mrb[2].mxu1 }
  0xfa   : > { %v4894_v27 = vpop.f32.mrb[3].mxu1  ;;  %4912 = vmatmul.mubr.msk.f32.vlgmr.msra.gmra.mrb[4].mxu1 %vm961_vm2, %v948_v26 }
  0xfb   : > { %5463 = vmatpush3.bf16.msra.mxu1 %v5462_v23  ;;  %4930 = vmatprep.mubr.msk.f32.mxu1 %vm5778_vm0, %v5779_v1  ;;  %v4448_v23 = vld [vmem:[%s6940_s28 + $0x78] sm:$0xff]  ;;  %v4453_v27 = vld [vmem:[%s6940_s28 + $0x80] sm:$0xff] }
  0xfc   : > { %5464 = vmatprep.subr.bf16.mxu1 %v5777_v0  ;;  %v5498_v24 = vpack.c.bf16 %v4448_v23, %v4447_v22  ;;  %v4476_v22 = vld [vmem:[%s6901_s14 + $0x70] sm:$0xff]  ;;  %v4477_v23 = vld [vmem:[%s6901_s14 + $0x78] sm:$0xff] }
  0xff   : > { %5466 = vmatpush3.bf16.msra.mxu1 %v5465_v28  ;;  %v4454_v28 = vld [vmem:[%s6940_s28 + $0x88] sm:$0xff] }
 0x100   : > { %5467 = vmatprep.subr.bf16.mxu1 %v5777_v0  ;;  %v5513_v32 = vpack.c.bf16 %v4454_v28, %v4453_v27  ;;  %v4483_v27 = vld [vmem:[%s6901_s14 + $0x80] sm:$0xff]  ;;  %v4484_v28 = vld [vmem:[%s6901_s14 + $0x88] sm:$0xff] }
 0x103   : > { %5469 = vmatpush3.bf16.msra.mxu1 %v5468_v31  ;;  %v4451_v31 = vld [vmem:[%s6942_s4 + $0x8] sm:$0xf]  ;;  %s6948_s4 = sld [smem:[#allocation9_spill]] }
 0x104   : > { %5470 = vmatprep.subr.bf16.mxu1 %v5777_v0 }
 0x107   : > { %5472 = vmatpush3.bf16.msra.mxu1 %v5471_v34  ;;  %v4456_v34 = vld [vmem:[%s6940_s28 + $0x98] sm:$0xff] }
 0x108   : > { %5473 = vmatprep.subr.bf16.mxu1 %v5777_v0 }
 0x10a   : > { %4931 = vmatmul.mubr.msk.f32.vlgmr.msra.gmra.mrb[6].mxu1 %vm961_vm2, %v865_v21  ;;  %v5495_v21 = vpack.c.bf16 %v4446_v20, %v4445_v19  ;;  %v4474_v19 = vld [vmem:[%s6901_s14 + $0x60] sm:$0xff]  ;;  %v4475_v20 = vld [vmem:[%s6901_s14 + $0x68] sm:$0xff] }
 0x10b   : > { %5475 = vmatpush3.bf16.msra.mxu1 %v5444_v4  ;;  %4937 = vmatprep.mubr.msk.f32.mxu1 %vm5778_vm0, %v5779_v1  ;;  %v5510_v4 = vpack.c.bf16 %v1357_v3, %v1356_v2 }
 0x10c   : > { %5476 = vmatprep.subr.bf16.mxu1 %v5777_v0 }
 0x10e   : > { %4938 = vmatmul.mubr.msk.f32.vlgmr.msra.gmra.mrb[8].mxu1 %vm795_vm1, %v4426_v35  ;;  %v5516_v35 = vpack.c.bf16 %v4456_v34, %v4455_v33  ;;  %v4485_v33 = vld [vmem:[%s6901_s14 + $0x90] sm:$0xff]  ;;  %v4486_v34 = vld [vmem:[%s6901_s14 + $0x98] sm:$0xff] }
 0x10f   : > { %4956 = vmatprep.mubr.msk.f32.mxu1 %vm5778_vm0, %v5779_v1  ;;  %5478 = vmatpush3.bf16.msra.mxu1 %v5477_v39  ;;  %v4459_v39 = vld [vmem:[%s6940_s28 + $0xb0] sm:$0xff] }
 0x110   : > { %5479 = vmatprep.subr.bf16.mxu1 %v5777_v0 }
 0x113   : > { %5481 = vmatpush3.bf16.msra.mxu1 %v5480_v41  ;;  %v5522_v41 = vpack.c.bf16 %v4460_v40, %v4459_v39  ;;  %v4489_v39 = vld [vmem:[%s6901_s14 + $0xb0] sm:$0xff]  ;;  %v4490_v40 = vld [vmem:[%s6901_s14 + $0xb8] sm:$0xff] }
 0x114   : > { %5482 = vmatprep.subr.bf16.mxu1 %v5777_v0 }
 0x117   : > { %5484 = vmatpush3.bf16.msra.mxu1 %v5483_v44 }
 0x118   : > { %5485 = vmatprep.subr.bf16.mxu1 %v5777_v0 }
 0x11b   : > { %5487 = vmatpush3.bf16.msra.mxu1 %v5486_v47 }
 0x11c   : > { %5500 = vmatprep.subr.bf16.mxu1 %v5777_v0 }
 0x1cd   : > { %v1031_v48 = vpop.f32.mrb[4].mxu1 }
 0x1ce   : > { %v4913_v49 = vpop.f32.mrb[5].mxu1 }
 0x1cf   : > { %v1851_v49 = vld [vmem:[%s6901_s14] sm:$0xff] }
 0x1dd   : > { %v1104_v50 = vpop.f32.mrb[6].mxu1 }
 0x1de   : > { %v1105_v51 = vadd.f32 %v1104_v50, %v1031_v48  ;;  %v4932_v52 = vpop.f32.mrb[7].mxu1  ;;  %v1852_v50 = vld [vmem:[%s6901_s14 + $0x8] sm:$0xff] }
 0x1df   : > { %v1853_v52 = vld [vmem:[%s6901_s14 + $0x10] sm:$0xff] }
 0x1e1   : > { %v1179_v53 = vpop.f32.mrb[8].mxu1 }
 0x1e2   : > { %v4939_v54 = vpop.f32.mrb[9].mxu1  ;;  %4957 = vmatmul.mubr.msk.f32.vlgmr.msra.gmra.mrb[10].mxu1 %vm961_vm2, %v1179_v53  ;;  %v1854_v53 = vld [vmem:[%s6901_s14 + $0x18] sm:$0xff] }
 0x1e3   : > { %5004 = vmatprep.mubr.msk.f32.mxu1 %vm5778_vm0, %v5779_v1  ;;  %5502 = vmatpush3.bf16.msra.mxu1 %v5501_v57  ;;  %v5540_v54 = vpack.c.bf16 %v1854_v53, %v1853_v52  ;;  %v5543_v57 = vpack.c.bf16 %v1856_v56, %v1855_v55  ;;  %v2347_v52 = vld [vmem:[%s6905_s18 + $0x10] sm:$0xff]  ;;  %v2348_v53 = vld [vmem:[%s6905_s18 + $0x18] sm:$0xff]  ;;  %v2349_v55 = vld [vmem:[%s6905_s18 + $0x20] sm:$0xff] }
 0x1e4   : > { %5503 = vmatprep.subr.bf16.mxu1 %v5777_v0  ;;  %v2350_v56 = vld [vmem:[%s6905_s18 + $0x28] sm:$0xff] }
 0x1e7   : > { %5505 = vmatpush3.bf16.msra.mxu1 %v5504_v60  ;;  %v5546_v60 = vpack.c.bf16 %v1858_v59, %v1857_v58  ;;  %v2351_v58 = vld [vmem:[%s6905_s18 + $0x30] sm:$0xff]  ;;  %v2352_v59 = vld [vmem:[%s6905_s18 + $0x38] sm:$0xff] }
 0x1e8   : > { %5506 = vmatprep.subr.bf16.mxu1 %v5777_v0 }
 0x1eb   : > { %5508 = vmatpush3.bf16.msra.mxu1 %v5507_v63 }
 0x1ec   : > { %5509 = vmatprep.subr.bf16.mxu1 %v5777_v0 }
 0x1ef   : > { %5511 = vmatpush3.bf16.msra.mxu1 %v5510_v4  ;;  %v4463_v4 = vld [vmem:[%s6899_s12] ss:$0 sm:$0xff] }
 0x1f0   : > { %5031 = vmatprep.subr.mxu1 %v5779_v1 }
 0x2b5   : > { %v1261_v5 = vpop.f32.mrb[10].mxu1 }
 0x2b6   : > { %v1265_v7 = vadd.f32 %v1261_v5, %v1105_v51  ;;  %v4958_v8 = vpop.f32.mrb[11].mxu1  ;;  %v5537_v51 = vpack.c.bf16 %v1852_v50, %v1851_v49  ;;  %v2345_v49 = vld [vmem:[%s6905_s18] sm:$0xff]  ;;  %v2346_v50 = vld [vmem:[%s6905_s18 + $0x8] sm:$0xff] }
 0x2b8   : > { %v1273_v9 = vadd.f32 %v4437_v6, %v1265_v7  ;;  %v4464_v6 = vld [vmem:[%s6900_s13] ss:$0 sm:$0xff] }
 0x2ba   : > { %v6082_v10 = vmax.f32 %v1273_v9, 0.0 }
 0x2bc   : > { %4960 = vmatpush3.msra.mxu0 %v6082_v10 }
 0x2bd   : > { %4962 = vmatmul.mubr.msk.f32.vlgmr.msra.gmra.mrb[0].mxu0 %vm1276_vm3, %v1275_v11  ;;  %4964 = vmatprep.subr.mxu0 %v5779_v1  ;;  %v6216_v11 = vld [vmem:[%s6944_s7] sm:$0xf] }
 0x2be   : > { %4965 = vmatpush3.msra.mxu0 %v6082_v10  ;;  %4966 = vmatprep.mubr.msk.f32.mxu0 %vm5778_vm0, %v5779_v1 }
 0x2bf   : > { %5488 = vmatprep.subr.bf16.mxu0 %v5777_v0 }
 0x2c1   : > { %4967 = vmatmul.mubr.msk.f32.vlgmr.msra.gmra.mrb[2].mxu0 %vm1276_vm3, %v4439_v14  ;;  %v6234_v14 = vld [vmem:[%s6944_s7 + $0x4] sm:$0xf] }
 0x2c2   : > { %5490 = vmatpush3.bf16.msra.mxu0 %v5489_v15  ;;  %4985 = vmatprep.mubr.msk.f32.mxu0 %vm5778_vm0, %v5779_v1  ;;  %v5525_v15 = vpack.c.bf16 %v4471_v13, %v4470_v12  ;;  %v4499_v12 = vld [vmem:[%s6905_s18 + $0x40] sm:$0xff]  ;;  %v4500_v13 = vld [vmem:[%s6905_s18 + $0x48] sm:$0xff] }
 0x2c3   : > { %5491 = vmatprep.subr.bf16.mxu0 %v5777_v0 }
 0x2c6   : > { %5493 = vmatpush3.bf16.msra.mxu0 %v5492_v18  ;;  %v5528_v18 = vpack.c.bf16 %v4473_v17, %v4472_v16  ;;  %v4501_v16 = vld [vmem:[%s6905_s18 + $0x50] sm:$0xff]  ;;  %v4502_v17 = vld [vmem:[%s6905_s18 + $0x58] sm:$0xff] }
 0x2c7   : > { %5494 = vmatprep.subr.bf16.mxu0 %v5777_v0 }
 0x2ca   : > { %5496 = vmatpush3.bf16.msra.mxu0 %v5495_v21  ;;  %v5531_v21 = vpack.c.bf16 %v4475_v20, %v4474_v19  ;;  %v4504_v19 = vld [vmem:[%s6905_s18 + $0x68] sm:$0xff] }
 0x2cb   : > { %5497 = vmatprep.subr.bf16.mxu0 %v5777_v0 }
 0x2ce   : > { %5499 = vmatpush3.bf16.msra.mxu0 %v5498_v24  ;;  %v5534_v24 = vpack.c.bf16 %v4477_v23, %v4476_v22 }
 0x2cf   : > { %5007 = vmatprep.subr.mxu0 %v5779_v1 }
 0x390   : > { %v1346_v25 = vpop.f32.mrb[0].mxu0 }
 0x391   : > { %v4963_v26 = vpop.f32.mrb[1].mxu0  ;;  %5005 = vmatmul.mubr.msk.f32.vlgmr.msra.gmra.mrb[12].mxu1 %vm961_vm2, %v1346_v25 }
 0x392   : > { %5033 = vmatprep.mubr.msk.f32.mxu1 %vm5778_vm0, %v5779_v1 }
 0x394   : > { %v1429_v29 = vpop.f32.mrb[2].mxu0 }
 0x395   : > { %v4968_v30 = vpop.f32.mrb[3].mxu0  ;;  %4986 = vmatmul.mubr.msk.f32.vlgmr.msra.gmra.mrb[4].mxu0 %vm961_vm2, %v1429_v29 }
 0x396   : > { %5008 = vmatpush3.msra.mxu0 %v6082_v10  ;;  %5009 = vmatprep.mubr.msk.f32.mxu0 %vm5778_vm0, %v5779_v1 }
 0x397   : > { %5512 = vmatprep.subr.bf16.mxu0 %v5777_v0 }
 0x399   : > { %5010 = vmatmul.mubr.msk.f32.vlgmr.msra.gmra.mrb[6].mxu0 %vm1276_vm3, %v4451_v31  ;;  %v6279_v31 = vld [vmem:[%s6944_s7 + $0x8] sm:$0xf] }
 0x39a   : > { %5514 = vmatpush3.bf16.msra.mxu0 %v5513_v32  ;;  %5028 = vmatprep.mubr.msk.f32.mxu0 %vm5778_vm0, %v5779_v1  ;;  %v5549_v32 = vpack.c.bf16 %v4484_v28, %v4483_v27 }
 0x39b   : > { %5515 = vmatprep.subr.bf16.mxu0 %v5777_v0 }
 0x39e   : > { %5517 = vmatpush3.bf16.msra.mxu0 %v5516_v35  ;;  %v5552_v35 = vpack.c.bf16 %v4486_v34, %v4485_v33  ;;  %v4515_v34 = vld [vmem:[%s6905_s18 + $0xa0] sm:$0xff] }
 0x39f   : > { %5518 = vmatprep.subr.bf16.mxu0 %v5777_v0 }
 0x3a2   : > { %5520 = vmatpush3.bf16.msra.mxu0 %v5519_v38  ;;  %v5555_v38 = vpack.c.bf16 %v4488_v37, %v4487_v36  ;;  %v4518_v37 = vld [vmem:[%s6905_s18 + $0xb8] sm:$0xff] }
 0x3a3   : > { %5521 = vmatprep.subr.bf16.mxu0 %v5777_v0 }
 0x3a6   : > { %5523 = vmatpush3.bf16.msra.mxu0 %v5522_v41  ;;  %v5558_v41 = vpack.c.bf16 %v4490_v40, %v4489_v39 }
 0x3a7   : > { %5536 = vmatprep.subr.bf16.mxu0 %v5777_v0 }
 0x464   : > { %v1584_v42 = vpop.f32.mrb[12].mxu1 }
 0x465   : > { %v5006_v43 = vpop.f32.mrb[13].mxu1 }
 0x468   : > { %v1511_v44 = vpop.f32.mrb[4].mxu0 }
 0x469   : > { %v1585_v45 = vadd.f32 %v1584_v42, %v1511_v44  ;;  %v4987_v46 = vpop.f32.mrb[5].mxu0 }
 0x46c   : > { %v1659_v47 = vpop.f32.mrb[6].mxu0 }
 0x46d   : > { %v5011_v48 = vpop.f32.mrb[7].mxu0  ;;  %5029 = vmatmul.mubr.msk.f32.vlgmr.msra.gmra.mrb[8].mxu0 %vm961_vm2, %v1659_v47 }
 0x46e   : > { %5076 = vmatprep.mubr.msk.f32.mxu0 %vm5778_vm0, %v5779_v1  ;;  %5538 = vmatpush3.bf16.msra.mxu0 %v5537_v51  ;;  %v5573_v51 = vpack.c.bf16 %v2346_v50, %v2345_v49 }
 0x46f   : > { %5539 = vmatprep.subr.bf16.mxu0 %v5777_v0 }
 0x472   : > { %5541 = vmatpush3.bf16.msra.mxu0 %v5540_v54  ;;  %v5576_v54 = vpack.c.bf16 %v2348_v53, %v2347_v52  ;;  %v3064_v52 = vld [vmem:[%s6908_s21 + $0x20] sm:$0xff]  ;;  %v3065_v53 = vld [vmem:[%s6908_s21 + $0x28] sm:$0xff] }
 0x473   : > { %5542 = vmatprep.subr.bf16.mxu0 %v5777_v0 }
 0x476   : > { %5544 = vmatpush3.bf16.msra.mxu0 %v5543_v57  ;;  %v5579_v57 = vpack.c.bf16 %v2350_v56, %v2349_v55  ;;  %v3066_v55 = vld [vmem:[%s6908_s21 + $0x30] sm:$0xff]  ;;  %v3067_v56 = vld [vmem:[%s6908_s21 + $0x38] sm:$0xff] }
 0x477   : > { %5545 = vmatprep.subr.bf16.mxu0 %v5777_v0 }
 0x47a   : > { %5547 = vmatpush3.bf16.msra.mxu0 %v5546_v60  ;;  %v5582_v60 = vpack.c.bf16 %v2352_v59, %v2351_v58  ;;  %v3052_v58 = vld [vmem:[%s6907_s20] sm:$0xff]  ;;  %v3053_v59 = vld [vmem:[%s6907_s20 + $0x8] sm:$0xff] }
 0x47b   : > { %5103 = vmatprep.subr.mxu0 %v5779_v1 }
 0x540   : > { %v1741_v61 = vpop.f32.mrb[8].mxu0 }
 0x541   : > { %v1745_v63 = vadd.f32 %v1741_v61, %v1585_v45  ;;  %v5030_v2 = vpop.f32.mrb[9].mxu0 }
 0x543   : > { %v1753_v3 = vadd.f32 %v4462_v62, %v1745_v63  ;;  %v4492_v62 = vld [vmem:[%s6902_s15] ss:$0 sm:$0xff] }
 0x545   : > { %v6207_v5 = vmax.f32 %v1753_v3, 0.0  ;;  %v4493_v3 = vld [vmem:[%s6903_s16] ss:$0 sm:$0xff] }
 0x547   : > { %v1762_v7 = vmul.f32 %v4463_v4, %v6207_v5 }
 0x549   : > { %v1770_v8 = vadd.f32 %v4464_v6, %v1762_v7  ;;  %v4494_v6 = vld [vmem:[%s6904_s17] ss:$0 sm:$0xff] }
 0x54b   : > { %v1771_v9 = vmax.f32 %v1770_v8, 0.0 }
 0x54d   : > { %5032 = vmatpush3.msk.msra.mxu1 %vm1777_vm4, %v1771_v9 }
 0x54e   : > { %5034 = vmatmul.mubr.msk.f32.vlgmr.msra.gmra.mrb[14].mxu1 %vm1773_vm5, %v6216_v11  ;;  %5036 = vmatprep.subr.mxu1 %v5779_v1 }
 0x54f   : > { %5037 = vmatpush3.msk.msra.mxu1 %vm1777_vm4, %v1771_v9  ;;  %5038 = vmatprep.mubr.msk.f32.mxu1 %vm5778_vm0, %v5779_v1 }
 0x550   : > { %5524 = vmatprep.subr.bf16.mxu1 %v5777_v0 }
 0x552   : > { %5039 = vmatmul.mubr.msk.f32.vlgmr.msra.gmra.mrb[16].mxu1 %vm1773_vm5, %v6234_v14 }
 0x553   : > { %5526 = vmatpush3.bf16.msra.mxu1 %v5525_v15  ;;  %5057 = vmatprep.mubr.msk.f32.mxu1 %vm5778_vm0, %v5779_v1  ;;  %v5561_v15 = vpack.c.bf16 %v4500_v13, %v4499_v12  ;;  %v4520_v12 = vld [vmem:[%s6906_s19] ss:$0 sm:$0xff] }
 0x554   : > { %5527 = vmatprep.subr.bf16.mxu1 %v5777_v0 }
 0x557   : > { %5529 = vmatpush3.bf16.msra.mxu1 %v5528_v18  ;;  %v4503_v18 = vld [vmem:[%s6905_s18 + $0x60] sm:$0xff] }
 0x558   : > { %5530 = vmatprep.subr.bf16.mxu1 %v5777_v0  ;;  %v5567_v20 = vpack.c.bf16 %v4504_v19, %v4503_v18  ;;  %v2740_v19 = vld [vmem:[%s6945_s6] sm:$0xf] }
 0x55b   : > { %5532 = vmatpush3.bf16.msra.mxu1 %v5531_v21  ;;  %v4506_v21 = vld [vmem:[%s6905_s18 + $0x78] sm:$0xff] }
 0x55c   : > { %5533 = vmatprep.subr.bf16.mxu1 %v5777_v0 }
 0x55f   : > { %5535 = vmatpush3.bf16.msra.mxu1 %v5534_v24 }
 0x560   : > { %5079 = vmatprep.subr.mxu1 %v5779_v1 }
 0x621   : > { %v1847_v25 = vpop.f32.mrb[14].mxu1 }
 0x622   : > { %v5035_v26 = vpop.f32.mrb[15].mxu1  ;;  %5077 = vmatmul.mubr.msk.f32.vlgmr.msra.gmra.mrb[10].mxu0 %vm961_vm2, %v1847_v25  ;;  %v4511_v25 = vld [vmem:[%s6905_s18 + $0x80] sm:$0xff] }
 0x623   : > { %5105 = vmatprep.mubr.msk.f32.mxu0 %vm5778_vm0, %v5779_v1  ;;  %v4512_v26 = vld [vmem:[%s6905_s18 + $0x88] sm:$0xff] }
 0x625   : > { %v1930_v29 = vpop.f32.mrb[16].mxu1 }
 0x626   : > { %v5040_v30 = vpop.f32.mrb[17].mxu1  ;;  %5058 = vmatmul.mubr.msk.f32.vlgmr.msra.gmra.mrb[18].mxu1 %vm961_vm2, %v1930_v29  ;;  %v5585_v29 = vpack.c.bf16 %v4512_v26, %v4511_v25  ;;  %v4535_v25 = vld [vmem:[%s6908_s21 + $0x50] sm:$0xff]  ;;  %v4536_v26 = vld [vmem:[%s6908_s21 + $0x58] sm:$0xff] }
 0x627   : > { %5080 = vmatpush3.msk.msra.mxu1 %vm1777_vm4, %v1771_v9  ;;  %5081 = vmatprep.mubr.msk.f32.mxu1 %vm5778_vm0, %v5779_v1  ;;  %v4513_v30 = vld [vmem:[%s6905_s18 + $0x90] sm:$0xff] }
 0x628   : > { %5548 = vmatprep.subr.bf16.mxu1 %v5777_v0 }
 0x62a   : > { %5082 = vmatmul.mubr.msk.f32.vlgmr.msra.gmra.mrb[20].mxu1 %vm1773_vm5, %v6279_v31 }
 0x62b   : > { %5550 = vmatpush3.bf16.msra.mxu1 %v5549_v32  ;;  %5100 = vmatprep.mubr.msk.f32.mxu1 %vm5778_vm0, %v5779_v1  ;;  %v4514_v32 = vld [vmem:[%s6905_s18 + $0x98] sm:$0xff] }
 0x62c   : > { %5551 = vmatprep.subr.bf16.mxu1 %v5777_v0  ;;  %v5588_v33 = vpack.c.bf16 %v4514_v32, %v4513_v30  ;;  %v5600_v30 = vpack.c.bf16 %v4536_v26, %v4535_v25  ;;  %v4537_v32 = vld [vmem:[%s6908_s21 + $0x60] sm:$0xff]  ;;  %v4563_v25 = vld [vmem:[%s6946_s29 + $0x8] sm:$0xff] }
 0x62f   : > { %5553 = vmatpush3.bf16.msra.mxu1 %v5552_v35  ;;  %v4516_v35 = vld [vmem:[%s6905_s18 + $0xa8] sm:$0xff] }
 0x630   : > { %5554 = vmatprep.subr.bf16.mxu1 %v5777_v0  ;;  %v5591_v36 = vpack.c.bf16 %v4516_v35, %v4515_v34  ;;  %v4551_v35 = vld [vmem:[%s6907_s20 + $0xb0] sm:$0xff] }
 0x633   : > { %5556 = vmatpush3.bf16.msra.mxu1 %v5555_v38 }
 0x634   : > { %5557 = vmatprep.subr.bf16.mxu1 %v5777_v0 }
 0x637   : > { %5559 = vmatpush3.bf16.msra.mxu1 %v5558_v41  ;;  %v3060_v41 = vld [vmem:[%s6908_s21] sm:$0xff] }
 0x638   : > { %5572 = vmatprep.subr.bf16.mxu1 %v5777_v0 }
 0x6f5   : > { %v2085_v42 = vpop.f32.mrb[10].mxu0 }
 0x6f6   : > { %v5078_v43 = vpop.f32.mrb[11].mxu0 }
 0x6f9   : > { %v2012_v44 = vpop.f32.mrb[18].mxu1 }
 0x6fa   : > { %v2086_v45 = vadd.f32 %v2085_v42, %v2012_v44  ;;  %v5059_v46 = vpop.f32.mrb[19].mxu1  ;;  %v3061_v42 = vld [vmem:[%s6908_s21 + $0x8] sm:$0xff] }
 0x6fb   : > { %v5621_v46 = vpack.c.bf16 %v3061_v42, %v3060_v41  ;;  %v4525_v41 = vld [vmem:[%s6907_s20 + $0x40] sm:$0xff]  ;;  %v4526_v42 = vld [vmem:[%s6907_s20 + $0x48] sm:$0xff] }
 0x6fd   : > { %v2160_v47 = vpop.f32.mrb[20].mxu1 }
 0x6fe   : > { %v5083_v48 = vpop.f32.mrb[21].mxu1  ;;  %5101 = vmatmul.mubr.msk.f32.vlgmr.msra.gmra.mrb[22].mxu1 %vm961_vm2, %v2160_v47  ;;  %v3062_v47 = vld [vmem:[%s6908_s21 + $0x10] sm:$0xff] }
 0x6ff   : > { %5148 = vmatprep.mubr.msk.f32.mxu1 %vm5778_vm0, %v5779_v1  ;;  %5574 = vmatpush3.bf16.msra.mxu1 %v5573_v51  ;;  %v3063_v48 = vld [vmem:[%s6908_s21 + $0x18] sm:$0xff] }
 0x700   : > { %5575 = vmatprep.subr.bf16.mxu1 %v5777_v0  ;;  %v5624_v51 = vpack.c.bf16 %v3063_v48, %v3062_v47  ;;  %v4529_v47 = vld [vmem:[%s6907_s20 + $0x60] sm:$0xff]  ;;  %v4530_v48 = vld [vmem:[%s6907_s20 + $0x68] sm:$0xff] }
 0x703   : > { %5577 = vmatpush3.bf16.msra.mxu1 %v5576_v54  ;;  %v5627_v54 = vpack.c.bf16 %v3065_v53, %v3064_v52  ;;  %v4554_v52 = vld [vmem:[%s6908_s21 + $0x80] sm:$0xff]  ;;  %v4555_v53 = vld [vmem:[%s6908_s21 + $0x88] sm:$0xff] }
 0x704   : > { %5578 = vmatprep.subr.bf16.mxu1 %v5777_v0 }
 0x707   : > { %5580 = vmatpush3.bf16.msra.mxu1 %v5579_v57  ;;  %v5630_v57 = vpack.c.bf16 %v3067_v56, %v3066_v55  ;;  %v4556_v55 = vld [vmem:[%s6908_s21 + $0x90] sm:$0xff]  ;;  %v4557_v56 = vld [vmem:[%s6908_s21 + $0x98] sm:$0xff] }
 0x708   : > { %5581 = vmatprep.subr.bf16.mxu1 %v5777_v0 }
 0x70b   : > { %5583 = vmatpush3.bf16.msra.mxu1 %v5582_v60  ;;  %v5633_v60 = vpack.c.bf16 %v3053_v59, %v3052_v58  ;;  %v5660_v59 = vpack.c.bf16 %v4557_v56, %v4556_v55  ;;  %v4582_v55 = vld [vmem:[%s6911_s24 + $0x58] sm:$0xff] }
 0x70c   : > { %5175 = vmatprep.subr.mxu1 %v5779_v1 }
 0x7d1   : > { %v2242_v61 = vpop.f32.mrb[22].mxu1 }
 0x7d2   : > { %v2246_v63 = vadd.f32 %v2242_v61, %v2086_v45  ;;  %v5102_v2 = vpop.f32.mrb[23].mxu1  ;;  %v3054_v61 = vld [vmem:[%s6907_s20 + $0x10] sm:$0xff] }
 0x7d3   : > { %v3056_v2 = vld [vmem:[%s6907_s20 + $0x20] sm:$0xff] }
 0x7d4   : > { %v2254_v4 = vadd.f32 %v4492_v62, %v2246_v63  ;;  %v3055_v62 = vld [vmem:[%s6907_s20 + $0x18] sm:$0xff] }
 0x7d5   : > { %v5636_v63 = vpack.c.bf16 %v3055_v62, %v3054_v61  ;;  %v4559_v61 = vld [vmem:[%s6908_s21 + $0xa8] sm:$0xff] }
 0x7d6   : > { %v2262_v7 = vmul.f32 %v4493_v3, %v2254_v4  ;;  %v3057_v3 = vld [vmem:[%s6907_s20 + $0x28] sm:$0xff] }
 0x7d7   : > { %v5639_v4 = vpack.c.bf16 %v3057_v3, %v3056_v2  ;;  %v4560_v3 = vld [vmem:[%s6908_s21 + $0xb0] sm:$0xff] }
 0x7d8   : > { %v2270_v8 = vadd.f32 %v4494_v6, %v2262_v7  ;;  %v3058_v6 = vld [vmem:[%s6907_s20 + $0x30] sm:$0xff]  ;;  %v3059_v7 = vld [vmem:[%s6907_s20 + $0x38] sm:$0xff] }
 0x7da   : > { %v2271_v9 = vmax.f32 %v2270_v8, 0.0  ;;  %v5642_v8 = vpack.c.bf16 %v3059_v7, %v3058_v6  ;;  %v3854_v7 = vld [vmem:[%s6911_s24] sm:$0xff] }
 0x7dc   : > { %5104 = vmatpush3.msk.msra.mxu0 %vm1777_vm4, %v2271_v9 }
 0x7dd   : > { %5106 = vmatmul.mubr.msk.f32.vlgmr.msra.gmra.mrb[12].mxu0 %vm1773_vm5, %v6216_v11  ;;  %5108 = vmatprep.subr.mxu0 %v5779_v1  ;;  %v5564_v11 = vpack.c.bf16 %v4502_v17, %v4501_v16  ;;  %v4545_v17 = vld [vmem:[%s6907_s20 + $0x80] sm:$0xff] }
 0x7de   : > { %5109 = vmatpush3.msk.msra.mxu0 %vm1777_vm4, %v2271_v9  ;;  %5110 = vmatprep.mubr.msk.f32.mxu0 %vm5778_vm0, %v5779_v1 }
 0x7df   : > { %5560 = vmatprep.subr.bf16.mxu0 %v5777_v0 }
 0x7e1   : > { %5111 = vmatmul.mubr.msk.f32.vlgmr.msra.gmra.mrb[14].mxu0 %vm1773_vm5, %v6234_v14  ;;  %v4505_v14 = vld [vmem:[%s6905_s18 + $0x70] sm:$0xff] }
 0x7e2   : > { %5562 = vmatpush3.bf16.msra.mxu0 %v5561_v15  ;;  %5129 = vmatprep.mubr.msk.f32.mxu0 %vm5778_vm0, %v5779_v1  ;;  %v5570_v22 = vpack.c.bf16 %v4506_v21, %v4505_v14  ;;  %v4534_v14 = vld [vmem:[%s6908_s21 + $0x48] sm:$0xff] }
 0x7e3   : > { %5563 = vmatprep.subr.bf16.mxu0 %v5777_v0 }
 0x7e6   : > { %5565 = vmatpush3.bf16.msra.mxu0 %v5564_v11  ;;  %v4546_v11 = vld [vmem:[%s6907_s20 + $0x88] sm:$0xff] }
 0x7e7   : > { %5566 = vmatprep.subr.bf16.mxu0 %v5777_v0  ;;  %v5645_v21 = vpack.c.bf16 %v4546_v11, %v4545_v17  ;;  %v3859_v17 = vld [vmem:[%s6911_s24 + $0x28] sm:$0xff] }
 0x7ea   : > { %5568 = vmatpush3.bf16.msra.mxu0 %v5567_v20  ;;  %v4533_v20 = vld [vmem:[%s6908_s21 + $0x40] sm:$0xff] }
 0x7eb   : > { %5569 = vmatprep.subr.bf16.mxu0 %v5777_v0 }
 0x7ee   : > { %5571 = vmatpush3.bf16.msra.mxu0 %v5570_v22  ;;  %v4547_v22 = vld [vmem:[%s6907_s20 + $0x90] sm:$0xff] }
 0x7ef   : > { %5151 = vmatprep.subr.mxu0 %v5779_v1 }
 0x8b0   : > { %v2341_v23 = vpop.f32.mrb[12].mxu0 }
 0x8b1   : > { %v5107_v24 = vpop.f32.mrb[13].mxu0  ;;  %5149 = vmatmul.mubr.msk.f32.vlgmr.msra.gmra.mrb[24].mxu1 %vm961_vm2, %v2341_v23  ;;  %v4548_v23 = vld [vmem:[%s6907_s20 + $0x98] sm:$0xff] }
 0x8b2   : > { %5177 = vmatprep.mubr.msk.f32.mxu1 %vm5778_vm0, %v5779_v1  ;;  %v5597_v24 = vpack.c.bf16 %v4534_v14, %v4533_v20 }
 0x8b4   : > { %v2419_v27 = vpop.f32.mrb[14].mxu0 }
 0x8b5   : > { %v5112_v28 = vpop.f32.mrb[15].mxu0  ;;  %5130 = vmatmul.mubr.msk.f32.vlgmr.msra.gmra.mrb[16].mxu0 %vm961_vm2, %v2419_v27  ;;  %v5648_v27 = vpack.c.bf16 %v4548_v23, %v4547_v22  ;;  %v3846_v22 = vld [vmem:[%s6910_s23] sm:$0xff]  ;;  %v3847_v23 = vld [vmem:[%s6910_s23 + $0x8] sm:$0xff] }
 0x8b6   : > { %5152 = vmatpush3.msk.msra.mxu0 %vm1777_vm4, %v2271_v9  ;;  %5153 = vmatprep.mubr.msk.f32.mxu0 %vm5778_vm0, %v5779_v1  ;;  %v4549_v28 = vld [vmem:[%s6907_s20 + $0xa0] sm:$0xff] }
 0x8b7   : > { %5584 = vmatprep.subr.bf16.mxu0 %v5777_v0 }
 0x8b9   : > { %5154 = vmatmul.mubr.msk.f32.vlgmr.msra.gmra.mrb[18].mxu0 %vm1773_vm5, %v6279_v31  ;;  %v4517_v31 = vld [vmem:[%s6905_s18 + $0xb0] sm:$0xff] }
 0x8ba   : > { %5586 = vmatpush3.bf16.msra.mxu0 %v5585_v29  ;;  %5172 = vmatprep.mubr.msk.f32.mxu0 %vm5778_vm0, %v5779_v1  ;;  %v5594_v38 = vpack.c.bf16 %v4518_v37, %v4517_v31  ;;  %v4550_v29 = vld [vmem:[%s6907_s20 + $0xa8] sm:$0xff]  ;;  %v4539_v37 = vld [vmem:[%s6908_s21 + $0x70] sm:$0xff] }
 0x8bb   : > { %5587 = vmatprep.subr.bf16.mxu0 %v5777_v0  ;;  %v5651_v34 = vpack.c.bf16 %v4550_v29, %v4549_v28  ;;  %v3374_v28 = vld [vmem:[%s6946_s29] sm:$0xff]  ;;  %v3848_v29 = vld [vmem:[%s6910_s23 + $0x10] sm:$0xff] }
 0x8be   : > { %5589 = vmatpush3.bf16.msra.mxu0 %v5588_v33  ;;  %v4538_v33 = vld [vmem:[%s6908_s21 + $0x68] sm:$0xff] }
 0x8bf   : > { %5590 = vmatprep.subr.bf16.mxu0 %v5777_v0  ;;  %v5603_v31 = vpack.c.bf16 %v4538_v33, %v4537_v32  ;;  %v3850_v33 = vld [vmem:[%s6910_s23 + $0x20] sm:$0xff] }
 0x8c2   : > { %5592 = vmatpush3.bf16.msra.mxu0 %v5591_v36  ;;  %v4552_v36 = vld [vmem:[%s6907_s20 + $0xb8] sm:$0xff] }
 0x8c3   : > { %5593 = vmatprep.subr.bf16.mxu0 %v5777_v0 }
 0x8c6   : > { %5595 = vmatpush3.bf16.msra.mxu0 %v5594_v38  ;;  %v4540_v38 = vld [vmem:[%s6908_s21 + $0x78] sm:$0xff] }
 0x8c7   : > { %5620 = vmatprep.subr.bf16.mxu0 %v5777_v0 }
 0x984   : > { %v2574_v39 = vpop.f32.mrb[24].mxu1 }
 0x985   : > { %v5150_v40 = vpop.f32.mrb[25].mxu1 }
 0x986   : > { %v5606_v40 = vpack.c.bf16 %v4540_v38, %v4539_v37 }
 0x988   : > { %v2501_v43 = vpop.f32.mrb[16].mxu0 }
 0x989   : > { %v2575_v44 = vadd.f32 %v2574_v39, %v2501_v43  ;;  %v5131_v45 = vpop.f32.mrb[17].mxu0  ;;  %v5654_v39 = vpack.c.bf16 %v4552_v36, %v4551_v35  ;;  %v5609_v43 = vpack.c.bf16 %v4526_v42, %v4525_v41  ;;  %v3852_v36 = vld [vmem:[%s6910_s23 + $0x30] sm:$0xff]  ;;  %v4568_v41 = vld [vmem:[%s6909_s22] ss:$0 sm:$0xff] }
 0x98a   : > { %v4528_v45 = vld [vmem:[%s6907_s20 + $0x58] sm:$0xff] }
 0x98c   : > { %v2644_v49 = vpop.f32.mrb[18].mxu0 }
 0x98d   : > { %v5155_v50 = vpop.f32.mrb[19].mxu0  ;;  %5173 = vmatmul.mubr.msk.f32.vlgmr.msra.gmra.mrb[20].mxu0 %vm961_vm2, %v2644_v49  ;;  %v5615_v49 = vpack.c.bf16 %v4530_v48, %v4529_v47  ;;  %v3538_v48 = vld [vmem:[%s6947_s10] sm:$0xff] }
 0x98e   : > { %5622 = vmatpush3.bf16.msra.mxu0 %v5621_v46  ;;  %5239 = vmatprep.mubr.msk.f32.mxu0 %vm5778_vm0, %v5779_v1  ;;  %v4532_v50 = vld [vmem:[%s6907_s20 + $0x78] sm:$0xff] }
 0x98f   : > { %5623 = vmatprep.subr.bf16.mxu0 %v5777_v0 }
 0x992   : > { %5625 = vmatpush3.bf16.msra.mxu0 %v5624_v51 }
 0x993   : > { %5626 = vmatprep.subr.bf16.mxu0 %v5777_v0 }
 0x996   : > { %5628 = vmatpush3.bf16.msra.mxu0 %v5627_v54  ;;  %v5657_v54 = vpack.c.bf16 %v4555_v53, %v4554_v52  ;;  %v4594_v52 = vld [vmem:[%s6910_s23 + $0x98] sm:$0xff] }
 0x997   : > { %5629 = vmatprep.subr.bf16.mxu0 %v5777_v0 }
 0x99a   : > { %5631 = vmatpush3.bf16.msra.mxu0 %v5630_v57 }
 0x99b   : > { %5632 = vmatprep.subr.bf16.mxu0 %v5777_v0 }
 0x99d   : > { %5240 = vmatmul.mubr.msk.f32.vlgmr.msra.gmra.mrb[22].mxu0 %vm961_vm2, %v6207_v5 }
 0x99e   : > { %5634 = vmatpush3.bf16.msra.mxu0 %v5633_v60  ;;  %5258 = vmatprep.mubr.msk.f32.mxu0 %vm5778_vm0, %v5779_v1  ;;  %v4558_v60 = vld [vmem:[%s6908_s21 + $0xa0] sm:$0xff] }
 0x99f   : > { %5635 = vmatprep.subr.bf16.mxu0 %v5777_v0  ;;  %v5663_v2 = vpack.c.bf16 %v4559_v61, %v4558_v60  ;;  %v4583_v60 = vld [vmem:[%s6911_s24 + $0x60] sm:$0xff]  ;;  %v4584_v61 = vld [vmem:[%s6911_s24 + $0x68] sm:$0xff] }
 0x9a2   : > { %5637 = vmatpush3.bf16.msra.mxu0 %v5636_v63 }
 0x9a3   : > { %5638 = vmatprep.subr.bf16.mxu0 %v5777_v0 }
 0x9a6   : > { %5640 = vmatpush3.bf16.msra.mxu0 %v5639_v4  ;;  %v4561_v4 = vld [vmem:[%s6908_s21 + $0xb8] sm:$0xff] }
 0x9a7   : > { %5641 = vmatprep.subr.bf16.mxu0 %v5777_v0  ;;  %v5666_v6 = vpack.c.bf16 %v4561_v4, %v4560_v3  ;;  %v5675_v3 = vpack.c.bf16 %v4584_v61, %v4583_v60  ;;  %v4585_v4 = vld [vmem:[%s6911_s24 + $0x70] sm:$0xff] }
 0x9aa   : > { %5643 = vmatpush3.bf16.msra.mxu0 %v5642_v8  ;;  %v3855_v8 = vld [vmem:[%s6911_s24 + $0x8] sm:$0xff] }
 0x9ab   : > { %5644 = vmatprep.subr.bf16.mxu0 %v5777_v0 }
 0xa60   : > { %v2726_v9 = vpop.f32.mrb[20].mxu0 }
 0xa61   : > { %v2730_v13 = vadd.f32 %v2726_v9, %v2575_v44  ;;  %v5174_v15 = vpop.f32.mrb[21].mxu0  ;;  %v4527_v44 = vld [vmem:[%s6907_s20 + $0x50] sm:$0xff]  ;;  %v5693_v9 = vpack.c.bf16 %v3855_v8, %v3854_v7 }
 0xa62   : > { %v5612_v46 = vpack.c.bf16 %v4528_v45, %v4527_v44  ;;  %v4591_v45 = vld [vmem:[%s6910_s23 + $0x80] sm:$0xff] }
 0xa63   : > { %v2738_v16 = vadd.f32 %v4520_v12, %v2730_v13  ;;  %v3856_v12 = vld [vmem:[%s6911_s24 + $0x10] sm:$0xff]  ;;  %v3857_v13 = vld [vmem:[%s6911_s24 + $0x18] sm:$0xff] }
 0xa64   : > { %v5696_v15 = vpack.c.bf16 %v3857_v13, %v3856_v12  ;;  %v4572_v12 = vld [vmem:[%s6910_s23 + $0x48] sm:$0xff] }
 0xa65   : > { %v6501_v18 = vadd.f32 %v2738_v16, %v6207_v5  ;;  %v3858_v16 = vld [vmem:[%s6911_s24 + $0x20] sm:$0xff] }
 0xa66   : > { %v5699_v11 = vpack.c.bf16 %v3859_v17, %v3858_v16  ;;  %v4574_v16 = vld [vmem:[%s6910_s23 + $0x58] sm:$0xff] }
 0xa67   : > { %5176 = vmatpush3.msk.msra.mxu1 %vm1777_vm4, %v6501_v18  ;;  %5259 = vmatmul.mubr.msk.f32.vlgmr.msra.gmra.mrb[22].mxu0 %vm961_vm2, %v6501_v18 }
 0xa68   : > { %5178 = vmatmul.mubr.msk.f32.vlgmr.msra.gmra.mrb[26].mxu1 %vm1773_vm5, %v2740_v19  ;;  %5180 = vmatprep.subr.mxu1 %v5779_v1 }
 0xa69   : > { %5181 = vmatpush3.msk.msra.mxu1 %vm1777_vm4, %v6207_v5  ;;  %5182 = vmatprep.mubr.msk.f32.mxu1 %vm5778_vm0, %v5779_v1 }
 0xa6a   : > { %5596 = vmatprep.subr.bf16.mxu1 %v5777_v0  ;;  %5646 = vmatpush3.bf16.msra.mxu0 %v5645_v21 }
 0xa6b   : > { %5647 = vmatprep.subr.bf16.mxu0 %v5777_v0  ;;  %5277 = vmatprep.mubr.msk.f32.mxu0 %vm5778_vm0, %v5779_v1 }
 0xa6c   : > { %5183 = vmatmul.mubr.msk.f32.vlgmr.msra.gmra.mrb[28].mxu1 %vm1773_vm5, %v2740_v19  ;;  %v3861_v19 = vld [vmem:[%s6911_s24 + $0x38] sm:$0xff] }
 0xa6d   : > { %5598 = vmatpush3.bf16.msra.mxu1 %v5597_v24  ;;  %5201 = vmatprep.mubr.msk.f32.mxu1 %vm5778_vm0, %v5779_v1  ;;  %v5705_v24 = vpack.c.bf16 %v3847_v23, %v3846_v22  ;;  %v4601_v22 = vld [vmem:[%s6911_s24 + $0x88] sm:$0xff] }
 0xa6e   : > { %5599 = vmatprep.subr.bf16.mxu1 %v5777_v0  ;;  %5649 = vmatpush3.bf16.msra.mxu0 %v5648_v27 }
 0xa6f   : > { %5650 = vmatprep.subr.bf16.mxu0 %v5777_v0 }
 0xa71   : > { %5601 = vmatpush3.bf16.msra.mxu1 %v5600_v30  ;;  %v3849_v30 = vld [vmem:[%s6910_s23 + $0x18] sm:$0xff] }
 0xa72   : > { %5602 = vmatprep.subr.bf16.mxu1 %v5777_v0  ;;  %5652 = vmatpush3.bf16.msra.mxu0 %v5651_v34  ;;  %v5708_v32 = vpack.c.bf16 %v3849_v30, %v3848_v29  ;;  %v3851_v34 = vld [vmem:[%s6910_s23 + $0x28] sm:$0xff]  ;;  %v4604_v29 = vld [vmem:[%s6911_s24 + $0xa0] sm:$0xff] }
 0xa73   : > { %5653 = vmatprep.subr.bf16.mxu0 %v5777_v0  ;;  %v5711_v35 = vpack.c.bf16 %v3851_v34, %v3850_v33  ;;  %v4605_v30 = vld [vmem:[%s6911_s24 + $0xa8] sm:$0xff] }
 0xa74   : > { %v5735_v34 = vpack.c.bf16 %v4605_v30, %v4604_v29 }
 0xa75   : > { %5604 = vmatpush3.bf16.msra.mxu1 %v5603_v31  ;;  %v3853_v31 = vld [vmem:[%s6910_s23 + $0x38] sm:$0xff] }
 0xa76   : > { %5605 = vmatprep.subr.bf16.mxu1 %v5777_v0  ;;  %5655 = vmatpush3.bf16.msra.mxu0 %v5654_v39  ;;  %v5714_v37 = vpack.c.bf16 %v3853_v31, %v3852_v36 }
 0xa77   : > { %5656 = vmatprep.subr.bf16.mxu0 %v5777_v0 }
 0xa79   : > { %5607 = vmatpush3.bf16.msra.mxu1 %v5606_v40 }
 0xa7a   : > { %5608 = vmatprep.subr.bf16.mxu1 %v5777_v0 }
 0xa7c   : > { %5202 = vmatmul.mubr.msk.f32.vlgmr.msra.gmra.mrb[30].mxu1 %vm961_vm2, %v6207_v5  ;;  %v4531_v5 = vld [vmem:[%s6907_s20 + $0x70] sm:$0xff] }
 0xa7d   : > { %5610 = vmatpush3.bf16.msra.mxu1 %v5609_v43  ;;  %5220 = vmatprep.mubr.msk.f32.mxu1 %vm5778_vm0, %v5779_v1  ;;  %v5618_v51 = vpack.c.bf16 %v4532_v50, %v4531_v5  ;;  %v4580_v5 = vld [vmem:[%s6911_s24 + $0x48] sm:$0xff] }
 0xa7e   : > { %5611 = vmatprep.subr.bf16.mxu1 %v5777_v0 }
 0xa81   : > { %5613 = vmatpush3.bf16.msra.mxu1 %v5612_v46  ;;  %v4592_v46 = vld [vmem:[%s6910_s23 + $0x88] sm:$0xff] }
 0xa82   : > { %5614 = vmatprep.subr.bf16.mxu1 %v5777_v0  ;;  %v5717_v50 = vpack.c.bf16 %v4592_v46, %v4591_v45 }
 0xa85   : > { %5616 = vmatpush3.bf16.msra.mxu1 %v5615_v49  ;;  %v4579_v49 = vld [vmem:[%s6911_s24 + $0x40] sm:$0xff] }
 0xa86   : > { %5617 = vmatprep.subr.bf16.mxu1 %v5777_v0  ;;  %v5669_v53 = vpack.c.bf16 %v4580_v5, %v4579_v49 }
 0xa89   : > { %5619 = vmatpush3.bf16.msra.mxu1 %v5618_v51  ;;  %v4593_v51 = vld [vmem:[%s6910_s23 + $0x90] sm:$0xff] }
 0xa8a   : > { %5299 = vmatprep.subr.mxu1 %v5779_v1  ;;  %v5720_v56 = vpack.c.bf16 %v4594_v52, %v4593_v51 }
 0xa8c   : > { %5221 = vmatmul.mubr.msk.f32.vlgmr.msra.gmra.mrb[30].mxu1 %vm961_vm2, %v6501_v18  ;;  %v3860_v18 = vld [vmem:[%s6911_s24 + $0x30] sm:$0xff] }
 0xa8d   : > { %5301 = vmatprep.mubr.msk.f32.mxu1 %vm5778_vm0, %v5779_v1  ;;  %v5702_v20 = vpack.c.bf16 %v3861_v19, %v3860_v18  ;;  %v4576_v18 = vld [vmem:[%s6910_s23 + $0x68] sm:$0xff] }
 0xb3b   : > { %v2813_v57 = vpop.f32.mrb[26].mxu1 }
 0xb3c   : > { %v5179_v58 = vpop.f32.mrb[27].mxu1  ;;  %5278 = vmatmul.mubr.msk.f32.vlgmr.msra.gmra.mrb[22].mxu0 %vm961_vm2, %v2813_v57  ;;  %v4595_v57 = vld [vmem:[%s6910_s23 + $0xa0] sm:$0xff] }
 0xb3d   : > { %5658 = vmatpush3.bf16.msra.mxu0 %v5657_v54  ;;  %5296 = vmatprep.mubr.msk.f32.mxu0 %vm5778_vm0, %v5779_v1  ;;  %v4581_v54 = vld [vmem:[%s6911_s24 + $0x50] sm:$0xff]  ;;  %v4596_v58 = vld [vmem:[%s6910_s23 + $0xa8] sm:$0xff] }
 0xb3e   : > { %5659 = vmatprep.subr.bf16.mxu0 %v5777_v0 }
 0xb3f   : > { %v2886_v62 = vpop.f32.mrb[28].mxu1 }
 0xb40   : > { %v5184_v63 = vpop.f32.mrb[29].mxu1 }
 0xb41   : > { %5661 = vmatpush3.bf16.msra.mxu0 %v5660_v59  ;;  %v5672_v59 = vpack.c.bf16 %v4582_v55, %v4581_v54  ;;  %v4597_v63 = vld [vmem:[%s6910_s23 + $0xb0] sm:$0xff] }
 0xb42   : > { %5662 = vmatprep.subr.bf16.mxu0 %v5777_v0 }
 0xb45   : > { %5664 = vmatpush3.bf16.msra.mxu0 %v5663_v2  ;;  %v4598_v2 = vld [vmem:[%s6910_s23 + $0xb8] sm:$0xff] }
 0xb46   : > { %5665 = vmatprep.subr.bf16.mxu0 %v5777_v0  ;;  %v5726_v7 = vpack.c.bf16 %v4598_v2, %v4597_v63 }
 0xb49   : > { %5667 = vmatpush3.bf16.msra.mxu0 %v5666_v6  ;;  %v4586_v6 = vld [vmem:[%s6911_s24 + $0x78] sm:$0xff] }
 0xb4a   : > { %5692 = vmatprep.subr.bf16.mxu0 %v5777_v0  ;;  %v5678_v8 = vpack.c.bf16 %v4586_v6, %v4585_v4 }
 0xb4c   : > { %5297 = vmatmul.mubr.msk.f32.vlgmr.msra.gmra.mrb[22].mxu0 %vm961_vm2, %v2886_v62  ;;  %v5723_v62 = vpack.c.bf16 %v4596_v58, %v4595_v57 }
 0xb4d   : > { %5694 = vmatpush3.bf16.msra.mxu0 %v5693_v9  ;;  %5373 = vmatprep.mubr.msk.f32.mxu0 %vm5778_vm0, %v5779_v1  ;;  %v4571_v9 = vld [vmem:[%s6910_s23 + $0x40] sm:$0xff] }
 0xb4e   : > { %5695 = vmatprep.subr.bf16.mxu0 %v5777_v0  ;;  %v5681_v13 = vpack.c.bf16 %v4572_v12, %v4571_v9 }
 0xb51   : > { %5697 = vmatpush3.bf16.msra.mxu0 %v5696_v15  ;;  %v4573_v15 = vld [vmem:[%s6910_s23 + $0x50] sm:$0xff] }
 0xb52   : > { %5698 = vmatprep.subr.bf16.mxu0 %v5777_v0  ;;  %v5684_v17 = vpack.c.bf16 %v4574_v16, %v4573_v15 }
 0xb55   : > { %5700 = vmatpush3.bf16.msra.mxu0 %v5699_v11  ;;  %v4575_v11 = vld [vmem:[%s6910_s23 + $0x60] sm:$0xff] }
 0xb56   : > { %5701 = vmatprep.subr.bf16.mxu0 %v5777_v0  ;;  %v5687_v19 = vpack.c.bf16 %v4576_v18, %v4575_v11 }
 0xb59   : > { %5703 = vmatpush3.bf16.msra.mxu0 %v5702_v20  ;;  %v4578_v20 = vld [vmem:[%s6910_s23 + $0x78] sm:$0xff] }
 0xb5a   : > { %5704 = vmatprep.subr.bf16.mxu0 %v5777_v0 }
 0xb5c   : > { %5374 = vmatmul.mubr.msk.f32.vlgmr.msra.gmra.mrb[24].mxu0 %vm961_vm2, %v6082_v10 }
 0xb5d   : > { %5392 = vmatprep.mubr.msk.f32.mxu0 %vm5778_vm0, %v5779_v1  ;;  %5706 = vmatpush3.bf16.msra.mxu0 %v5705_v24  ;;  %v4602_v24 = vld [vmem:[%s6911_s24 + $0x90] sm:$0xff] }
 0xb5e   : > { %5707 = vmatprep.subr.bf16.mxu0 %v5777_v0 }
 0xb5f   : > { %v3048_v14 = vpop.f32.mrb[30].mxu1 }
 0xb60   : > { %v5222_v21 = vpop.f32.mrb[31].mxu1 }
 0xb61   : > { %5709 = vmatpush3.bf16.msra.mxu0 %v5708_v32  ;;  %v4600_v21 = vld [vmem:[%s6911_s24 + $0x80] sm:$0xff] }
 0xb62   : > { %5710 = vmatprep.subr.bf16.mxu0 %v5777_v0  ;;  %v5729_v23 = vpack.c.bf16 %v4601_v22, %v4600_v21 }
 0xb65   : > { %5712 = vmatpush3.bf16.msra.mxu0 %v5711_v35  ;;  %v4607_v35 = vld [vmem:[%s6911_s24 + $0xb8] sm:$0xff] }
 0xb66   : > { %5713 = vmatprep.subr.bf16.mxu0 %v5777_v0 }
 0xb69   : > { %5715 = vmatpush3.bf16.msra.mxu0 %v5714_v37 }
 0xb6a   : > { %5716 = vmatprep.subr.bf16.mxu0 %v5777_v0 }
 0xc1f   : > { %v3369_v26 = vpop.f32.mrb[22].mxu0 }
 0xc20   : > { %v5298_v27 = vpop.f32.mrb[23].mxu0  ;;  %5300 = vmatpush3.msk.msra.mxu1 %vm1777_vm4, %v3369_v26 }
 0xc21   : > { %5302 = vmatmul.mubr.msk.f32.vlgmr.msra.gmra.mrb[32].mxu1 %vm1773_vm5, %v4563_v25  ;;  %5304 = vmatprep.subr.mxu1 %v5779_v1  ;;  %v4603_v25 = vld [vmem:[%s6911_s24 + $0x98] sm:$0xff] }
 0xc22   : > { %5305 = vmatpush3.msk.msra.mxu1 %vm1777_vm4, %v3048_v14  ;;  %5306 = vmatprep.mubr.msk.f32.mxu1 %vm5778_vm0, %v5779_v1 }
 0xc23   : > { %5309 = vmatprep.subr.mxu1 %v5779_v1 }
 0xc25   : > { %5307 = vmatmul.mubr.msk.f32.vlgmr.msra.gmra.mrb[34].mxu1 %vm1773_vm5, %v3374_v28  ;;  %v5732_v28 = vpack.c.bf16 %v4603_v25, %v4602_v24 }
 0xc26   : > { %5311 = vmatprep.mubr.msk.f32.mxu1 %vm5778_vm0, %v5779_v1 }
 0xcf4   : > { %v3449_v38 = vpop.f32.mrb[32].mxu1 }
 0xcf5   : > { %v5303_v39 = vpop.f32.mrb[33].mxu1 }
 0xcf8   : > { %v3525_v40 = vpop.f32.mrb[34].mxu1 }
 0xcf9   : > { %v3526_v42 = vadd.f32 %v3525_v40, %v3449_v38  ;;  %v5308_v43 = vpop.f32.mrb[35].mxu1  ;;  %v4609_v38 = vld [vmem:[%s6948_s4 + $0x10] sm:$0xff]  ;;  %v4610_v40 = vld [vmem:[%s6948_s4 + $0x18] sm:$0xff] }
 0xcfa   : > { %v4615_v43 = vld [vmem:[%s6912_s25] ss:$0 sm:$0xff] }
 0xcfb   : > { %v3536_v44 = vadd.f32 %v4568_v41, %v3526_v42  ;;  %v4169_v42 = vld [vmem:[%s6948_s4 + $0x8] sm:$0xff] }
 0xcfd   : > { %v6727_v47 = vmax.f32 %v3536_v44, 0.0 }
 0xcff   : > { %5310 = vmatpush3.msra.mxu1 %v6727_v47  ;;  %5393 = vmatmul.mubr.msk.f32.vlgmr.msra.gmra.mrb[24].mxu0 %vm961_vm2, %v6727_v47 }
 0xd00   : > { %5312 = vmatmul.mubr.msk.f32.vlgmr.msra.gmra.mrb[36].mxu1 %vm1276_vm3, %v3538_v48  ;;  %5314 = vmatprep.subr.mxu1 %v5779_v1 }
 0xd01   : > { %5315 = vmatpush3.msra.mxu1 %v6082_v10  ;;  %5316 = vmatprep.mubr.msk.f32.mxu1 %vm5778_vm0, %v5779_v1 }
 0xd02   : > { %5668 = vmatprep.subr.bf16.mxu1 %v5777_v0  ;;  %5718 = vmatpush3.bf16.msra.mxu0 %v5717_v50 }
 0xd03   : > { %5719 = vmatprep.subr.bf16.mxu0 %v5777_v0  ;;  %5411 = vmatprep.mubr.msk.f32.mxu0 %vm5778_vm0, %v5779_v1 }
 0xd04   : > { %5317 = vmatmul.mubr.msk.f32.vlgmr.msra.gmra.mrb[38].mxu1 %vm1276_vm3, %v3538_v48 }
 0xd05   : > { %5670 = vmatpush3.bf16.msra.mxu1 %v5669_v53  ;;  %5335 = vmatprep.mubr.msk.f32.mxu1 %vm5778_vm0, %v5779_v1 }
 0xd06   : > { %5671 = vmatprep.subr.bf16.mxu1 %v5777_v0  ;;  %5721 = vmatpush3.bf16.msra.mxu0 %v5720_v56 }
 0xd07   : > { %5722 = vmatprep.subr.bf16.mxu0 %v5777_v0 }
 0xd09   : > { %5673 = vmatpush3.bf16.msra.mxu1 %v5672_v59 }
 0xd0a   : > { %5674 = vmatprep.subr.bf16.mxu1 %v5777_v0  ;;  %5724 = vmatpush3.bf16.msra.mxu0 %v5723_v62 }
 0xd0b   : > { %5725 = vmatprep.subr.bf16.mxu0 %v5777_v0 }
 0xd0d   : > { %5676 = vmatpush3.bf16.msra.mxu1 %v5675_v3 }
 0xd0e   : > { %5677 = vmatprep.subr.bf16.mxu1 %v5777_v0  ;;  %5727 = vmatpush3.bf16.msra.mxu0 %v5726_v7 }
 0xd0f   : > { %5728 = vmatprep.subr.bf16.mxu0 %v5777_v0 }
 0xd11   : > { %5679 = vmatpush3.bf16.msra.mxu1 %v5678_v8 }
 0xd12   : > { %5680 = vmatprep.subr.bf16.mxu1 %v5777_v0 }
 0xd14   : > { %5336 = vmatmul.mubr.msk.f32.vlgmr.msra.gmra.mrb[40].mxu1 %vm961_vm2, %v6082_v10  ;;  %v4577_v10 = vld [vmem:[%s6910_s23 + $0x70] sm:$0xff] }
 0xd15   : > { %5682 = vmatpush3.bf16.msra.mxu1 %v5681_v13  ;;  %5354 = vmatprep.mubr.msk.f32.mxu1 %vm5778_vm0, %v5779_v1  ;;  %v5690_v14 = vpack.c.bf16 %v4578_v20, %v4577_v10 }
 0xd16   : > { %5683 = vmatprep.subr.bf16.mxu1 %v5777_v0 }
 0xd19   : > { %5685 = vmatpush3.bf16.msra.mxu1 %v5684_v17 }
 0xd1a   : > { %5686 = vmatprep.subr.bf16.mxu1 %v5777_v0 }
 0xd1d   : > { %5688 = vmatpush3.bf16.msra.mxu1 %v5687_v19 }
 0xd1e   : > { %5689 = vmatprep.subr.bf16.mxu1 %v5777_v0 }
 0xd21   : > { %5691 = vmatpush3.bf16.msra.mxu1 %v5690_v14 }
 0xd24   : > { %5355 = vmatmul.mubr.msk.f32.vlgmr.msra.gmra.mrb[40].mxu1 %vm961_vm2, %v6727_v47 }
 0xd25   : > { %5435 = vmatprep.mubr.msk.f32.mxu1 %vm1276_vm3, %v4609_v38 }
 0xdd3   : > { %v3608_v26 = vpop.f32.mrb[36].mxu1 }
 0xdd4   : > { %v5313_v27 = vpop.f32.mrb[37].mxu1  ;;  %5412 = vmatmul.mubr.msk.f32.vlgmr.msra.gmra.mrb[24].mxu0 %vm961_vm2, %v3608_v26 }
 0xdd5   : > { %5730 = vmatpush3.bf16.msra.mxu0 %v5729_v23  ;;  %5430 = vmatprep.mubr.msk.f32.mxu0 %vm5778_vm0, %v5779_v1  ;;  %v4606_v1 = vld [vmem:[%s6911_s24 + $0xb0] sm:$0xff] }
 0xdd6   : > { %5731 = vmatprep.subr.bf16.mxu0 %v5777_v0  ;;  %v5738_v36 = vpack.c.bf16 %v4607_v35, %v4606_v1 }
 0xdd7   : > { %v3678_v32 = vpop.f32.mrb[38].mxu1 }
 0xdd8   : > { %v5318_v33 = vpop.f32.mrb[39].mxu1 }
 0xdd9   : > { %5733 = vmatpush3.bf16.msra.mxu0 %v5732_v28 }
 0xdda   : > { %5734 = vmatprep.subr.bf16.mxu0 %v5777_v0 }
 0xddd   : > { %5736 = vmatpush3.bf16.msra.mxu0 %v5735_v34 }
 0xdde   : > { %5737 = vmatprep.subr.bf16.mxu0 %v5777_v0  ;;  %v4168_v0 = vld [vmem:[%s6948_s4] sm:$0xff] }
 0xde1   : > { %5739 = vmatpush3.bf16.msra.mxu0 %v5738_v36 }
 0xde4   : > { %5431 = vmatmul.mubr.msk.f32.vlgmr.msra.gmra.mrb[24].mxu0 %vm961_vm2, %v3678_v32 }
 0xdf7   : > { %v3842_v31 = vpop.f32.mrb[40].mxu1 }
 0xdf8   : > { %v5356_v37 = vpop.f32.mrb[41].mxu1 }
 0xeb7   : > { %v4163_v39 = vpop.f32.mrb[24].mxu0 }
 0xeb8   : > { %v5432_v41 = vpop.f32.mrb[25].mxu0  ;;  %5433 = vmatprep.subr.mxu1 %v4163_v39 }
 0xeb9   : > { %5434 = vmatpush3.msra.mxu1 %v4163_v39 }
 0xeba   : > { %5436 = vmatmul.mubr.msk.f32.vlgmr.msra.gmra.mrb[42].mxu1 %vm1276_vm3, %v4610_v40  ;;  %5438 = vmatprep.subr.mxu1 %v3842_v31 }
 0xebb   : > { %5439 = vmatpush3.msra.mxu1 %v3842_v31  ;;  %5440 = vmatprep.mubr.msk.f32.mxu1 %vm1276_vm3, %v4168_v0 }
 0xec2   : > { %5441 = vmatmul.mubr.msk.f32.vlgmr.msra.gmra.mrb[42].mxu1 %vm1276_vm3, %v4169_v42 }
 0xf95   : > { %v5442_v44 = vpop.f32.mrb[42].mxu1 }
 0xf96   : > { %v4343_v45 = vadd.f32 %v5442_v44, %v4615_v43  ;;  %v4326_v46 = vpop.f32.mrb[43].mxu1 }
 0xf97   : > { %v4342_v47 = vadd.f32 %v4615_v43, %v4326_v46 }
 0xf98   : > { %v4345_v48 = vmax.f32 %v4343_v45, 0.0 }
 0xf99   : > { %v4344_v49 = vmax.f32 %v4342_v47, 0.0 }
 0xf9a   : > { %4348 = vst.msk [vmem:[%s791_s0 + $0x8] sm:$0xff] %vm4346_vm6, %v4345_v48 }
 0xf9b   : > { %4347 = vst.msk [vmem:[%s791_s0] sm:$0xff] %vm4346_vm6, %v4344_v49 }
 0xf9c PF: > { %s36_s27 = sadd.s32 1, %s5775_s27  }
 0xf9d   : > { %p33_p4 = scmp.ge.s32.totalorder %s36_s27, 4  }
 0xf9f   :  { %35 = sbr.rel (!%p33_p4) target bundleno = 13 (0xd), region = 178 }

</bundles_post_ra>
